<compile_context>
chip_gen: v5e
topology: v5e:2x2
jax: 0.10.0
libtpu: 0.0.40
codegen_flags: <defaults>
</compile_context>

<pallas_src>
import functools

import jax
import jax.numpy as jnp
import numpy as np
from jax.experimental import pallas as pl
from jax.experimental.pallas import tpu as pltpu

BN_EPS = 1e-5


# ----------------- fused kernel: conv + BN(batch stats) + ReLU ----------------- #
def conv_bn_relu_kernel(x_ref, w_ref, gamma_ref, beta_ref, out_ref,
                        y_scr, xpad_scr,
                        *, kh, kw, wp, wo, nb, cin, m_ext, inv_count):
    """Single-invocation fused ConvModule forward.

    x_ref:     (N, Cin, L2)         bf16  spatially padded input, channel-major, flat
    w_ref:     (kh*kw, Cout, Cin_p) bf16  per-tap weight slices (Cin zero-padded to 8)
    gamma_ref: (Cout, 1)            f32   BN weight
    beta_ref:  (Cout, 1)            f32   BN bias
    out_ref:   (N, Cout, M_pad)     f32   BN+ReLU output over extended/padded columns
    y_scr:     (N, Cout, M_pad)     f32   VMEM-resident conv output (never hits HBM)
    xpad_scr:  (Cin_p, L2)          bf16  channel-pad staging buffer
    """
    cout, m_pad = out_ref.shape[1], out_ref.shape[2]

    # Validity mask over extended columns, built in-kernel (no DMA'd mask input).
    # column c is a real conv output iff c < m_ext and (c mod wp) < wo.
    # Vector integer modulo is avoided via an exact float floor-divide trick.
    col = jax.lax.broadcasted_iota(jnp.int32, (1, m_pad), 1)
    colf = col.astype(jnp.float32)
    row = jnp.floor((colf + 0.5) * (1.0 / wp))
    in_row = colf - row * jnp.float32(wp)
    mask = jnp.where((in_row < wo) & (col < m_ext), 1.0, 0.0).astype(jnp.float32)

    # Zero the staging buffer once: rows cin..Cin_p-1 stay zero so the K=Cin_p
    # matmuls are exact even though HBM only supplied the real channels.
    xpad_scr[...] = jnp.zeros_like(xpad_scr)

    s = jnp.zeros((cout, 1), jnp.float32)
    ss = jnp.zeros((cout, 1), jnp.float32)
    for b in range(nb):                                   # static unroll, nb is tiny
        xpad_scr[0:cin, :] = x_ref[b]                     # channel-pad in VMEM
        xb = xpad_scr[...]                                # (Cin_p, L2) bf16
        acc = jnp.zeros((cout, m_pad), jnp.float32)
        for i in range(kh):
            for j in range(kw):
                off = i * wp + j
                acc = acc + jnp.dot(w_ref[i * kw + j], xb[:, off:off + m_pad],
                                    preferred_element_type=jnp.float32)
        y_scr[b] = acc                                    # stays in VMEM
        ym = acc * mask                                   # zero out invalid columns
        s = s + jnp.sum(ym, axis=1, keepdims=True)
        ss = ss + jnp.sum(ym * ym, axis=1, keepdims=True)

    # Exact training-mode BN statistics (biased variance) + affine + ReLU.
    mean = s * inv_count
    var = jnp.maximum(ss * inv_count - mean * mean, 0.0)
    scale = gamma_ref[...] * jax.lax.rsqrt(var + BN_EPS)  # (Cout, 1)
    shift = beta_ref[...] - mean * scale                  # (Cout, 1)
    for b in range(nb):
        out_ref[b] = jnp.maximum(y_scr[b] * scale + shift, 0.0)


# ----------------------------------- wrapper ----------------------------------- #
@functools.partial(jax.jit, static_argnames=("stride", "padding"))
def conv_module_forward(x, weight, gamma, beta, *, stride=1, padding=1):
    """Forward of ConvModule(order=('conv','norm','act')) for NCHW input x.

    x:      (N, Cin, H, W)
    weight: (Cout, Cin, kh, kw)  PyTorch conv weight layout, no bias
    gamma, beta: (Cout,)         BatchNorm affine parameters
    """
    if stride != 1:
        raise NotImplementedError("only stride=1 (the reproduced config) is lowered")

    n, cin, h, w = x.shape
    cout, _, kh, kw = weight.shape

    hp, wp = h + 2 * padding, w + 2 * padding
    ho, wo = hp - kh + 1, wp - kw + 1
    m_ext = ho * wp                                   # extended output row length
    m_pad = ((m_ext + 127) // 128) * 128              # lane-dense store width
    cin_p = ((cin + 7) // 8) * 8                      # MXU K alignment (VMEM only)

    # every shifted tap slice [off, off + m_pad) must stay inside defined zeros
    max_off = (kh - 1) * wp + (kw - 1)
    l_needed = max_off + m_pad
    extra_rows = max(0, -(-(l_needed - hp * wp) // wp))
    l2 = (hp + extra_rows) * wp

    # --- single cast + single pad + single reshape of the input ---
    xp = jnp.pad(x.astype(jnp.bfloat16),
                 ((0, 0), (0, 0),
                  (padding, padding + extra_rows),     # bottom rows double as lane headroom
                  (padding, padding)))
    x_flat = xp.reshape(n, cin, l2)

    # --- tiny weight prep: per-tap (Cout, Cin_p) slices, zero-padded K ---
    w_r = jnp.transpose(weight, (2, 3, 0, 1)).astype(jnp.bfloat16)  # (kh,kw,Cout,Cin)
    w_r = jnp.pad(w_r, ((0, 0), (0, 0), (0, 0), (0, cin_p - cin)))
    w_r = w_r.reshape(kh * kw, cout, cin_p)

    gamma2 = gamma.astype(jnp.float32).reshape(cout, 1)
    beta2 = beta.astype(jnp.float32).reshape(cout, 1)

    kernel = functools.partial(conv_bn_relu_kernel, kh=kh, kw=kw, wp=wp, wo=wo,
                               nb=n, cin=cin, m_ext=m_ext,
                               inv_count=1.0 / float(n * ho * wo))

    flops = 2 * n * kh * kw * cout * cin_p * m_pad + 10 * n * cout * m_pad
    bytes_accessed = (n * cin * l2 * 2 + kh * kw * cout * cin_p * 2
                      + 2 * cout * 4 + n * cout * m_pad * 4)

    out_flat = pl.pallas_call(
        kernel,
        out_shape=jax.ShapeDtypeStruct((n, cout, m_pad), jnp.float32),
        grid=(1,),
        in_specs=[
            pl.BlockSpec((n, cin, l2), lambda i: (0, 0, 0)),
            pl.BlockSpec((kh * kw, cout, cin_p), lambda i: (0, 0, 0)),
            pl.BlockSpec((cout, 1), lambda i: (0, 0)),
            pl.BlockSpec((cout, 1), lambda i: (0, 0)),
        ],
        out_specs=pl.BlockSpec((n, cout, m_pad), lambda i: (0, 0, 0)),
        scratch_shapes=[
            pltpu.VMEM((n, cout, m_pad), jnp.float32),   # VMEM-resident conv output
            pltpu.VMEM((cin_p, l2), jnp.bfloat16),       # channel-pad staging buffer
        ],
        compiler_params=pltpu.CompilerParams(dimension_semantics=("arbitrary",)),
        cost_estimate=pl.CostEstimate(flops=flops, transcendentals=cout,
                                      bytes_accessed=bytes_accessed),
    )(x_flat, w_r, gamma2, beta2)

    # channel-major layout already matches NCHW; drop extended/padded columns.
    return out_flat[:, :, :m_ext].reshape(n, cout, ho, wp)[:, :, :, :wo]


# ---------------------------------- reference ---------------------------------- #
def _reference(x, weight, gamma, beta, stride=1, padding=1):
    # Mirrors the kernel's numerics: bf16 conv inputs, f32 accumulation, f32 BN/ReLU.
    y = jax.lax.conv_general_dilated(
        x.astype(jnp.bfloat16), weight.astype(jnp.bfloat16),
        window_strides=(stride, stride),
        padding=[(padding, padding), (padding, padding)],
        dimension_numbers=("NCHW", "OIHW", "NCHW"),
        preferred_element_type=jnp.float32)
    mean = jnp.mean(y, axis=(0, 2, 3), keepdims=True)
    var = jnp.mean((y - mean) ** 2, axis=(0, 2, 3), keepdims=True)
    yh = (y - mean) * jax.lax.rsqrt(var + BN_EPS)
    yh = yh * gamma.reshape(1, -1, 1, 1) + beta.reshape(1, -1, 1, 1)
    return jnp.maximum(yh, 0.0)


if __name__ == "__main__":
    N, CIN, H, W = 2, 4, 16, 16
    COUT, KH, KW = 8, 3, 3
    STRIDE, PADDING = 1, 1

    key = jax.random.PRNGKey(0)
    kx, kw_ = jax.random.split(key)

    x = jax.random.normal(kx, (N, CIN, H, W), dtype=jnp.float32)

    # kaiming_normal_(mode='fan_out', nonlinearity='relu'): std = sqrt(2 / fan_out)
    fan_out = COUT * KH * KW
    weight = jax.random.normal(kw_, (COUT, CIN, KH, KW), dtype=jnp.float32) * jnp.sqrt(2.0 / fan_out)

    # constant_init(norm, 1, bias=0)
    gamma = jnp.ones((COUT,), dtype=jnp.float32)
    beta = jnp.zeros((COUT,), dtype=jnp.float32)

    out = conv_module_forward(x, weight, gamma, beta, stride=STRIDE, padding=PADDING)
    out = jax.block_until_ready(out)

    ref = jax.block_until_ready(_reference(x, weight, gamma, beta, STRIDE, PADDING))
    np.testing.assert_allclose(np.asarray(out), np.asarray(ref), atol=2e-3, rtol=2e-3)

    print("KERNEL_OK")
</pallas_src>

<mosaic_0001>
module attributes {stable_mosaic.version = 11 : i64} {
  func.func @conv_bn_relu_kernel(%arg0: i32, %arg1: memref<2x4x432xbf16, #tpu.memory_space<vmem>>, %arg2: memref<9x8x8xbf16, #tpu.memory_space<vmem>>, %arg3: memref<8x1xf32, #tpu.memory_space<vmem>>, %arg4: memref<8x1xf32, #tpu.memory_space<vmem>>, %arg5: memref<2x8x384xf32, #tpu.memory_space<vmem>>, %arg6: memref<2x8x384xf32, #tpu.memory_space<vmem>>, %arg7: memref<8x432xbf16, #tpu.memory_space<vmem>>) attributes {dimension_semantics = [#tpu.dimension_semantics<arbitrary>], iteration_bounds = array<i64: 1>, scalar_prefetch = 0 : i64, scratch_operands = 2 : i64, tpu.core_type = #tpu.core_type<tc>, window_params = [{pipeline_mode = #tpu.pipeline_mode<synchronous>, transform_indices = @transform_0, window_bounds = array<i64: 2, 4, 432>}, {pipeline_mode = #tpu.pipeline_mode<synchronous>, transform_indices = @transform_1, window_bounds = array<i64: 9, 8, 8>}, {pipeline_mode = #tpu.pipeline_mode<synchronous>, transform_indices = @transform_2, window_bounds = array<i64: 8, 1>}, {pipeline_mode = #tpu.pipeline_mode<synchronous>, transform_indices = @transform_3, window_bounds = array<i64: 8, 1>}, {pipeline_mode = #tpu.pipeline_mode<synchronous>, transform_indices = @transform_4, window_bounds = array<i64: 2, 8, 384>}]} {
    %0 = tpu.iota {dimensions = array<i32: 1>} : vector<1x384xi32>
    %1 = arith.sitofp %0 : vector<1x384xi32> to vector<1x384xf32>
    %cst = arith.constant 5.000000e-01 : f32
    %2 = vector.broadcast %cst : f32 to vector<1x384xf32>
    %3 = arith.addf %1, %2 : vector<1x384xf32>
    %cst_0 = arith.constant 0.055555556 : f32
    %4 = vector.broadcast %cst_0 : f32 to vector<1x384xf32>
    %5 = arith.mulf %3, %4 : vector<1x384xf32>
    %6 = math.floor %5 : vector<1x384xf32>
    %cst_1 = arith.constant 1.800000e+01 : f32
    %7 = vector.broadcast %cst_1 : f32 to vector<1x384xf32>
    %8 = arith.mulf %6, %7 : vector<1x384xf32>
    %9 = arith.subf %1, %8 : vector<1x384xf32>
    %cst_2 = arith.constant 1.600000e+01 : f32
    %10 = vector.broadcast %cst_2 : f32 to vector<1x384xf32>
    %11 = arith.cmpf olt, %9, %10 : vector<1x384xf32>
    %c288_i32 = arith.constant 288 : i32
    %12 = vector.broadcast %c288_i32 : i32 to vector<1x384xi32>
    %13 = arith.cmpi slt, %0, %12 : vector<1x384xi32>
    %14 = arith.andi %11, %13 : vector<1x384xi1>
    %cst_3 = arith.constant 1.000000e+00 : f32
    %cst_4 = arith.constant 0.000000e+00 : f32
    %15 = vector.broadcast %cst_3 : f32 to vector<1x384xf32>
    %16 = vector.broadcast %cst_4 : f32 to vector<1x384xf32>
    %17 = arith.select %14, %15, %16 : vector<1x384xi1>, vector<1x384xf32>
    %cst_5 = arith.constant 0.000000e+00 : bf16
    %18 = vector.broadcast %cst_5 : bf16 to vector<8x432xbf16>
    %c0 = arith.constant 0 : index
    %c0_6 = arith.constant 0 : index
    %19 = vector.load %arg7[%c0, %c0_6] : memref<8x432xbf16, #tpu.memory_space<vmem>>, vector<8x432xbf16>
    tpu.vector_store %arg7[%c0, %c0_6], %18 {strides = array<i32>} : memref<8x432xbf16, #tpu.memory_space<vmem>>, vector<8x432xbf16>,
    %cst_7 = arith.constant 0.000000e+00 : f32
    %20 = vector.broadcast %cst_7 : f32 to vector<8x1xf32>
    %cst_8 = arith.constant 0.000000e+00 : f32
    %21 = vector.broadcast %cst_8 : f32 to vector<8x1xf32>
    %c0_9 = arith.constant 0 : index
    %c0_10 = arith.constant 0 : index
    %c0_11 = arith.constant 0 : index
    %22 = vector.load %arg1[%c0_9, %c0_10, %c0_11] : memref<2x4x432xbf16, #tpu.memory_space<vmem>>, vector<1x4x432xbf16>
    %23 = vector.shape_cast %22 : vector<1x4x432xbf16> to vector<4x432xbf16>
    %c0_12 = arith.constant 0 : index
    %c0_13 = arith.constant 0 : index
    %24 = vector.load %arg7[%c0_12, %c0_13] : memref<8x432xbf16, #tpu.memory_space<vmem>>, vector<4x432xbf16>
    tpu.vector_store %arg7[%c0_12, %c0_13], %23 {strides = array<i32>} : memref<8x432xbf16, #tpu.memory_space<vmem>>, vector<4x432xbf16>,
    %c0_14 = arith.constant 0 : index
    %c0_15 = arith.constant 0 : index
    %25 = vector.load %arg7[%c0_14, %c0_15] : memref<8x432xbf16, #tpu.memory_space<vmem>>, vector<8x432xbf16>
    %cst_16 = arith.constant 0.000000e+00 : f32
    %26 = vector.broadcast %cst_16 : f32 to vector<8x384xf32>
    %c0_17 = arith.constant 0 : index
    %c0_18 = arith.constant 0 : index
    %c0_19 = arith.constant 0 : index
    %27 = vector.load %arg2[%c0_17, %c0_18, %c0_19] : memref<9x8x8xbf16, #tpu.memory_space<vmem>>, vector<1x8x8xbf16>
    %28 = vector.shape_cast %27 : vector<1x8x8xbf16> to vector<8x8xbf16>
    %29 = vector.extract_strided_slice %25 {offsets = [0, 0], sizes = [8, 384], strides = [1, 1]} : vector<8x432xbf16> to vector<8x384xbf16>
    %cst_20 = arith.constant dense<0.000000e+00> : vector<8x384xf32>
    %30 = tpu.matmul %28, %29, %cst_20 {dimension_numbers = #tpu.dot_dimension_numbers<[1], [0], [0], [1], [0, 0, 1, 1], [], []>} : vector<8x8xbf16>, vector<8x384xbf16>, vector<8x384xf32> -> vector<8x384xf32>
    %31 = arith.addf %26, %30 : vector<8x384xf32>
    %c1 = arith.constant 1 : index
    %c0_21 = arith.constant 0 : index
    %c0_22 = arith.constant 0 : index
    %32 = vector.load %arg2[%c1, %c0_21, %c0_22] : memref<9x8x8xbf16, #tpu.memory_space<vmem>>, vector<1x8x8xbf16>
    %33 = vector.shape_cast %32 : vector<1x8x8xbf16> to vector<8x8xbf16>
    %34 = vector.extract_strided_slice %25 {offsets = [0, 1], sizes = [8, 384], strides = [1, 1]} : vector<8x432xbf16> to vector<8x384xbf16>
    %cst_23 = arith.constant dense<0.000000e+00> : vector<8x384xf32>
    %35 = tpu.matmul %33, %34, %cst_23 {dimension_numbers = #tpu.dot_dimension_numbers<[1], [0], [0], [1], [0, 0, 1, 1], [], []>} : vector<8x8xbf16>, vector<8x384xbf16>, vector<8x384xf32> -> vector<8x384xf32>
    %36 = arith.addf %31, %35 : vector<8x384xf32>
    %c2 = arith.constant 2 : index
    %c0_24 = arith.constant 0 : index
    %c0_25 = arith.constant 0 : index
    %37 = vector.load %arg2[%c2, %c0_24, %c0_25] : memref<9x8x8xbf16, #tpu.memory_space<vmem>>, vector<1x8x8xbf16>
    %38 = vector.shape_cast %37 : vector<1x8x8xbf16> to vector<8x8xbf16>
    %39 = vector.extract_strided_slice %25 {offsets = [0, 2], sizes = [8, 384], strides = [1, 1]} : vector<8x432xbf16> to vector<8x384xbf16>
    %cst_26 = arith.constant dense<0.000000e+00> : vector<8x384xf32>
    %40 = tpu.matmul %38, %39, %cst_26 {dimension_numbers = #tpu.dot_dimension_numbers<[1], [0], [0], [1], [0, 0, 1, 1], [], []>} : vector<8x8xbf16>, vector<8x384xbf16>, vector<8x384xf32> -> vector<8x384xf32>
    %41 = arith.addf %36, %40 : vector<8x384xf32>
    %c3 = arith.constant 3 : index
    %c0_27 = arith.constant 0 : index
    %c0_28 = arith.constant 0 : index
    %42 = vector.load %arg2[%c3, %c0_27, %c0_28] : memref<9x8x8xbf16, #tpu.memory_space<vmem>>, vector<1x8x8xbf16>
    %43 = vector.shape_cast %42 : vector<1x8x8xbf16> to vector<8x8xbf16>
    %44 = vector.extract_strided_slice %25 {offsets = [0, 18], sizes = [8, 384], strides = [1, 1]} : vector<8x432xbf16> to vector<8x384xbf16>
    %cst_29 = arith.constant dense<0.000000e+00> : vector<8x384xf32>
    %45 = tpu.matmul %43, %44, %cst_29 {dimension_numbers = #tpu.dot_dimension_numbers<[1], [0], [0], [1], [0, 0, 1, 1], [], []>} : vector<8x8xbf16>, vector<8x384xbf16>, vector<8x384xf32> -> vector<8x384xf32>
    %46 = arith.addf %41, %45 : vector<8x384xf32>
    %c4 = arith.constant 4 : index
    %c0_30 = arith.constant 0 : index
    %c0_31 = arith.constant 0 : index
    %47 = vector.load %arg2[%c4, %c0_30, %c0_31] : memref<9x8x8xbf16, #tpu.memory_space<vmem>>, vector<1x8x8xbf16>
    %48 = vector.shape_cast %47 : vector<1x8x8xbf16> to vector<8x8xbf16>
    %49 = vector.extract_strided_slice %25 {offsets = [0, 19], sizes = [8, 384], strides = [1, 1]} : vector<8x432xbf16> to vector<8x384xbf16>
    %cst_32 = arith.constant dense<0.000000e+00> : vector<8x384xf32>
    %50 = tpu.matmul %48, %49, %cst_32 {dimension_numbers = #tpu.dot_dimension_numbers<[1], [0], [0], [1], [0, 0, 1, 1], [], []>} : vector<8x8xbf16>, vector<8x384xbf16>, vector<8x384xf32> -> vector<8x384xf32>
    %51 = arith.addf %46, %50 : vector<8x384xf32>
    %c5 = arith.constant 5 : index
    %c0_33 = arith.constant 0 : index
    %c0_34 = arith.constant 0 : index
    %52 = vector.load %arg2[%c5, %c0_33, %c0_34] : memref<9x8x8xbf16, #tpu.memory_space<vmem>>, vector<1x8x8xbf16>
    %53 = vector.shape_cast %52 : vector<1x8x8xbf16> to vector<8x8xbf16>
    %54 = vector.extract_strided_slice %25 {offsets = [0, 20], sizes = [8, 384], strides = [1, 1]} : vector<8x432xbf16> to vector<8x384xbf16>
    %cst_35 = arith.constant dense<0.000000e+00> : vector<8x384xf32>
    %55 = tpu.matmul %53, %54, %cst_35 {dimension_numbers = #tpu.dot_dimension_numbers<[1], [0], [0], [1], [0, 0, 1, 1], [], []>} : vector<8x8xbf16>, vector<8x384xbf16>, vector<8x384xf32> -> vector<8x384xf32>
    %56 = arith.addf %51, %55 : vector<8x384xf32>
    %c6 = arith.constant 6 : index
    %c0_36 = arith.constant 0 : index
    %c0_37 = arith.constant 0 : index
    %57 = vector.load %arg2[%c6, %c0_36, %c0_37] : memref<9x8x8xbf16, #tpu.memory_space<vmem>>, vector<1x8x8xbf16>
    %58 = vector.shape_cast %57 : vector<1x8x8xbf16> to vector<8x8xbf16>
    %59 = vector.extract_strided_slice %25 {offsets = [0, 36], sizes = [8, 384], strides = [1, 1]} : vector<8x432xbf16> to vector<8x384xbf16>
    %cst_38 = arith.constant dense<0.000000e+00> : vector<8x384xf32>
    %60 = tpu.matmul %58, %59, %cst_38 {dimension_numbers = #tpu.dot_dimension_numbers<[1], [0], [0], [1], [0, 0, 1, 1], [], []>} : vector<8x8xbf16>, vector<8x384xbf16>, vector<8x384xf32> -> vector<8x384xf32>
    %61 = arith.addf %56, %60 : vector<8x384xf32>
    %c7 = arith.constant 7 : index
    %c0_39 = arith.constant 0 : index
    %c0_40 = arith.constant 0 : index
    %62 = vector.load %arg2[%c7, %c0_39, %c0_40] : memref<9x8x8xbf16, #tpu.memory_space<vmem>>, vector<1x8x8xbf16>
    %63 = vector.shape_cast %62 : vector<1x8x8xbf16> to vector<8x8xbf16>
    %64 = vector.extract_strided_slice %25 {offsets = [0, 37], sizes = [8, 384], strides = [1, 1]} : vector<8x432xbf16> to vector<8x384xbf16>
    %cst_41 = arith.constant dense<0.000000e+00> : vector<8x384xf32>
    %65 = tpu.matmul %63, %64, %cst_41 {dimension_numbers = #tpu.dot_dimension_numbers<[1], [0], [0], [1], [0, 0, 1, 1], [], []>} : vector<8x8xbf16>, vector<8x384xbf16>, vector<8x384xf32> -> vector<8x384xf32>
    %66 = arith.addf %61, %65 : vector<8x384xf32>
    %c8 = arith.constant 8 : index
    %c0_42 = arith.constant 0 : index
    %c0_43 = arith.constant 0 : index
    %67 = vector.load %arg2[%c8, %c0_42, %c0_43] : memref<9x8x8xbf16, #tpu.memory_space<vmem>>, vector<1x8x8xbf16>
    %68 = vector.shape_cast %67 : vector<1x8x8xbf16> to vector<8x8xbf16>
    %69 = vector.extract_strided_slice %25 {offsets = [0, 38], sizes = [8, 384], strides = [1, 1]} : vector<8x432xbf16> to vector<8x384xbf16>
    %cst_44 = arith.constant dense<0.000000e+00> : vector<8x384xf32>
    %70 = tpu.matmul %68, %69, %cst_44 {dimension_numbers = #tpu.dot_dimension_numbers<[1], [0], [0], [1], [0, 0, 1, 1], [], []>} : vector<8x8xbf16>, vector<8x384xbf16>, vector<8x384xf32> -> vector<8x384xf32>
    %71 = arith.addf %66, %70 : vector<8x384xf32>
    %c0_45 = arith.constant 0 : index
    %c0_46 = arith.constant 0 : index
    %c0_47 = arith.constant 0 : index
    %72 = vector.load %arg6[%c0_45, %c0_46, %c0_47] : memref<2x8x384xf32, #tpu.memory_space<vmem>>, vector<1x8x384xf32>
    %73 = vector.shape_cast %72 : vector<1x8x384xf32> to vector<8x384xf32>
    %74 = vector.shape_cast %71 : vector<8x384xf32> to vector<1x8x384xf32>
    tpu.vector_store %arg6[%c0_45, %c0_46, %c0_47], %74 {strides = array<i32>} : memref<2x8x384xf32, #tpu.memory_space<vmem>>, vector<1x8x384xf32>,
    %75 = vector.broadcast %17 : vector<1x384xf32> to vector<8x384xf32>
    %76 = arith.mulf %71, %75 : vector<8x384xf32>
    %cst_48 = arith.constant dense<0.000000e+00> : vector<8xf32>
    %77 = vector.multi_reduction <add>, %76, %cst_48 [1] : vector<8x384xf32> to vector<8xf32>
    %78 = vector.shape_cast %77 : vector<8xf32> to vector<8x1xf32>
    %79 = arith.addf %20, %78 : vector<8x1xf32>
    %80 = arith.mulf %76, %76 : vector<8x384xf32>
    %cst_49 = arith.constant dense<0.000000e+00> : vector<8xf32>
    %81 = vector.multi_reduction <add>, %80, %cst_49 [1] : vector<8x384xf32> to vector<8xf32>
    %82 = vector.shape_cast %81 : vector<8xf32> to vector<8x1xf32>
    %83 = arith.addf %21, %82 : vector<8x1xf32>
    %c1_50 = arith.constant 1 : index
    %c0_51 = arith.constant 0 : index
    %c0_52 = arith.constant 0 : index
    %84 = vector.load %arg1[%c1_50, %c0_51, %c0_52] : memref<2x4x432xbf16, #tpu.memory_space<vmem>>, vector<1x4x432xbf16>
    %85 = vector.shape_cast %84 : vector<1x4x432xbf16> to vector<4x432xbf16>
    %c0_53 = arith.constant 0 : index
    %c0_54 = arith.constant 0 : index
    %86 = vector.load %arg7[%c0_53, %c0_54] : memref<8x432xbf16, #tpu.memory_space<vmem>>, vector<4x432xbf16>
    tpu.vector_store %arg7[%c0_53, %c0_54], %85 {strides = array<i32>} : memref<8x432xbf16, #tpu.memory_space<vmem>>, vector<4x432xbf16>,
    %c0_55 = arith.constant 0 : index
    %c0_56 = arith.constant 0 : index
    %87 = vector.load %arg7[%c0_55, %c0_56] : memref<8x432xbf16, #tpu.memory_space<vmem>>, vector<8x432xbf16>
    %cst_57 = arith.constant 0.000000e+00 : f32
    %88 = vector.broadcast %cst_57 : f32 to vector<8x384xf32>
    %c0_58 = arith.constant 0 : index
    %c0_59 = arith.constant 0 : index
    %c0_60 = arith.constant 0 : index
    %89 = vector.load %arg2[%c0_58, %c0_59, %c0_60] : memref<9x8x8xbf16, #tpu.memory_space<vmem>>, vector<1x8x8xbf16>
    %90 = vector.shape_cast %89 : vector<1x8x8xbf16> to vector<8x8xbf16>
    %91 = vector.extract_strided_slice %87 {offsets = [0, 0], sizes = [8, 384], strides = [1, 1]} : vector<8x432xbf16> to vector<8x384xbf16>
    %cst_61 = arith.constant dense<0.000000e+00> : vector<8x384xf32>
    %92 = tpu.matmul %90, %91, %cst_61 {dimension_numbers = #tpu.dot_dimension_numbers<[1], [0], [0], [1], [0, 0, 1, 1], [], []>} : vector<8x8xbf16>, vector<8x384xbf16>, vector<8x384xf32> -> vector<8x384xf32>
    %93 = arith.addf %88, %92 : vector<8x384xf32>
    %c1_62 = arith.constant 1 : index
    %c0_63 = arith.constant 0 : index
    %c0_64 = arith.constant 0 : index
    %94 = vector.load %arg2[%c1_62, %c0_63, %c0_64] : memref<9x8x8xbf16, #tpu.memory_space<vmem>>, vector<1x8x8xbf16>
    %95 = vector.shape_cast %94 : vector<1x8x8xbf16> to vector<8x8xbf16>
    %96 = vector.extract_strided_slice %87 {offsets = [0, 1], sizes = [8, 384], strides = [1, 1]} : vector<8x432xbf16> to vector<8x384xbf16>
    %cst_65 = arith.constant dense<0.000000e+00> : vector<8x384xf32>
    %97 = tpu.matmul %95, %96, %cst_65 {dimension_numbers = #tpu.dot_dimension_numbers<[1], [0], [0], [1], [0, 0, 1, 1], [], []>} : vector<8x8xbf16>, vector<8x384xbf16>, vector<8x384xf32> -> vector<8x384xf32>
    %98 = arith.addf %93, %97 : vector<8x384xf32>
    %c2_66 = arith.constant 2 : index
    %c0_67 = arith.constant 0 : index
    %c0_68 = arith.constant 0 : index
    %99 = vector.load %arg2[%c2_66, %c0_67, %c0_68] : memref<9x8x8xbf16, #tpu.memory_space<vmem>>, vector<1x8x8xbf16>
    %100 = vector.shape_cast %99 : vector<1x8x8xbf16> to vector<8x8xbf16>
    %101 = vector.extract_strided_slice %87 {offsets = [0, 2], sizes = [8, 384], strides = [1, 1]} : vector<8x432xbf16> to vector<8x384xbf16>
    %cst_69 = arith.constant dense<0.000000e+00> : vector<8x384xf32>
    %102 = tpu.matmul %100, %101, %cst_69 {dimension_numbers = #tpu.dot_dimension_numbers<[1], [0], [0], [1], [0, 0, 1, 1], [], []>} : vector<8x8xbf16>, vector<8x384xbf16>, vector<8x384xf32> -> vector<8x384xf32>
    %103 = arith.addf %98, %102 : vector<8x384xf32>
    %c3_70 = arith.constant 3 : index
    %c0_71 = arith.constant 0 : index
    %c0_72 = arith.constant 0 : index
    %104 = vector.load %arg2[%c3_70, %c0_71, %c0_72] : memref<9x8x8xbf16, #tpu.memory_space<vmem>>, vector<1x8x8xbf16>
    %105 = vector.shape_cast %104 : vector<1x8x8xbf16> to vector<8x8xbf16>
    %106 = vector.extract_strided_slice %87 {offsets = [0, 18], sizes = [8, 384], strides = [1, 1]} : vector<8x432xbf16> to vector<8x384xbf16>
    %cst_73 = arith.constant dense<0.000000e+00> : vector<8x384xf32>
    %107 = tpu.matmul %105, %106, %cst_73 {dimension_numbers = #tpu.dot_dimension_numbers<[1], [0], [0], [1], [0, 0, 1, 1], [], []>} : vector<8x8xbf16>, vector<8x384xbf16>, vector<8x384xf32> -> vector<8x384xf32>
    %108 = arith.addf %103, %107 : vector<8x384xf32>
    %c4_74 = arith.constant 4 : index
    %c0_75 = arith.constant 0 : index
    %c0_76 = arith.constant 0 : index
    %109 = vector.load %arg2[%c4_74, %c0_75, %c0_76] : memref<9x8x8xbf16, #tpu.memory_space<vmem>>, vector<1x8x8xbf16>
    %110 = vector.shape_cast %109 : vector<1x8x8xbf16> to vector<8x8xbf16>
    %111 = vector.extract_strided_slice %87 {offsets = [0, 19], sizes = [8, 384], strides = [1, 1]} : vector<8x432xbf16> to vector<8x384xbf16>
    %cst_77 = arith.constant dense<0.000000e+00> : vector<8x384xf32>
    %112 = tpu.matmul %110, %111, %cst_77 {dimension_numbers = #tpu.dot_dimension_numbers<[1], [0], [0], [1], [0, 0, 1, 1], [], []>} : vector<8x8xbf16>, vector<8x384xbf16>, vector<8x384xf32> -> vector<8x384xf32>
    %113 = arith.addf %108, %112 : vector<8x384xf32>
    %c5_78 = arith.constant 5 : index
    %c0_79 = arith.constant 0 : index
    %c0_80 = arith.constant 0 : index
    %114 = vector.load %arg2[%c5_78, %c0_79, %c0_80] : memref<9x8x8xbf16, #tpu.memory_space<vmem>>, vector<1x8x8xbf16>
    %115 = vector.shape_cast %114 : vector<1x8x8xbf16> to vector<8x8xbf16>
    %116 = vector.extract_strided_slice %87 {offsets = [0, 20], sizes = [8, 384], strides = [1, 1]} : vector<8x432xbf16> to vector<8x384xbf16>
    %cst_81 = arith.constant dense<0.000000e+00> : vector<8x384xf32>
    %117 = tpu.matmul %115, %116, %cst_81 {dimension_numbers = #tpu.dot_dimension_numbers<[1], [0], [0], [1], [0, 0, 1, 1], [], []>} : vector<8x8xbf16>, vector<8x384xbf16>, vector<8x384xf32> -> vector<8x384xf32>
    %118 = arith.addf %113, %117 : vector<8x384xf32>
    %c6_82 = arith.constant 6 : index
    %c0_83 = arith.constant 0 : index
    %c0_84 = arith.constant 0 : index
    %119 = vector.load %arg2[%c6_82, %c0_83, %c0_84] : memref<9x8x8xbf16, #tpu.memory_space<vmem>>, vector<1x8x8xbf16>
    %120 = vector.shape_cast %119 : vector<1x8x8xbf16> to vector<8x8xbf16>
    %121 = vector.extract_strided_slice %87 {offsets = [0, 36], sizes = [8, 384], strides = [1, 1]} : vector<8x432xbf16> to vector<8x384xbf16>
    %cst_85 = arith.constant dense<0.000000e+00> : vector<8x384xf32>
    %122 = tpu.matmul %120, %121, %cst_85 {dimension_numbers = #tpu.dot_dimension_numbers<[1], [0], [0], [1], [0, 0, 1, 1], [], []>} : vector<8x8xbf16>, vector<8x384xbf16>, vector<8x384xf32> -> vector<8x384xf32>
    %123 = arith.addf %118, %122 : vector<8x384xf32>
    %c7_86 = arith.constant 7 : index
    %c0_87 = arith.constant 0 : index
    %c0_88 = arith.constant 0 : index
    %124 = vector.load %arg2[%c7_86, %c0_87, %c0_88] : memref<9x8x8xbf16, #tpu.memory_space<vmem>>, vector<1x8x8xbf16>
    %125 = vector.shape_cast %124 : vector<1x8x8xbf16> to vector<8x8xbf16>
    %126 = vector.extract_strided_slice %87 {offsets = [0, 37], sizes = [8, 384], strides = [1, 1]} : vector<8x432xbf16> to vector<8x384xbf16>
    %cst_89 = arith.constant dense<0.000000e+00> : vector<8x384xf32>
    %127 = tpu.matmul %125, %126, %cst_89 {dimension_numbers = #tpu.dot_dimension_numbers<[1], [0], [0], [1], [0, 0, 1, 1], [], []>} : vector<8x8xbf16>, vector<8x384xbf16>, vector<8x384xf32> -> vector<8x384xf32>
    %128 = arith.addf %123, %127 : vector<8x384xf32>
    %c8_90 = arith.constant 8 : index
    %c0_91 = arith.constant 0 : index
    %c0_92 = arith.constant 0 : index
    %129 = vector.load %arg2[%c8_90, %c0_91, %c0_92] : memref<9x8x8xbf16, #tpu.memory_space<vmem>>, vector<1x8x8xbf16>
    %130 = vector.shape_cast %129 : vector<1x8x8xbf16> to vector<8x8xbf16>
    %131 = vector.extract_strided_slice %87 {offsets = [0, 38], sizes = [8, 384], strides = [1, 1]} : vector<8x432xbf16> to vector<8x384xbf16>
    %cst_93 = arith.constant dense<0.000000e+00> : vector<8x384xf32>
    %132 = tpu.matmul %130, %131, %cst_93 {dimension_numbers = #tpu.dot_dimension_numbers<[1], [0], [0], [1], [0, 0, 1, 1], [], []>} : vector<8x8xbf16>, vector<8x384xbf16>, vector<8x384xf32> -> vector<8x384xf32>
    %133 = arith.addf %128, %132 : vector<8x384xf32>
    %c1_94 = arith.constant 1 : index
    %c0_95 = arith.constant 0 : index
    %c0_96 = arith.constant 0 : index
    %134 = vector.load %arg6[%c1_94, %c0_95, %c0_96] : memref<2x8x384xf32, #tpu.memory_space<vmem>>, vector<1x8x384xf32>
    %135 = vector.shape_cast %134 : vector<1x8x384xf32> to vector<8x384xf32>
    %136 = vector.shape_cast %133 : vector<8x384xf32> to vector<1x8x384xf32>
    tpu.vector_store %arg6[%c1_94, %c0_95, %c0_96], %136 {strides = array<i32>} : memref<2x8x384xf32, #tpu.memory_space<vmem>>, vector<1x8x384xf32>,
    %137 = vector.broadcast %17 : vector<1x384xf32> to vector<8x384xf32>
    %138 = arith.mulf %133, %137 : vector<8x384xf32>
    %cst_97 = arith.constant dense<0.000000e+00> : vector<8xf32>
    %139 = vector.multi_reduction <add>, %138, %cst_97 [1] : vector<8x384xf32> to vector<8xf32>
    %140 = vector.shape_cast %139 : vector<8xf32> to vector<8x1xf32>
    %141 = arith.addf %79, %140 : vector<8x1xf32>
    %142 = arith.mulf %138, %138 : vector<8x384xf32>
    %cst_98 = arith.constant dense<0.000000e+00> : vector<8xf32>
    %143 = vector.multi_reduction <add>, %142, %cst_98 [1] : vector<8x384xf32> to vector<8xf32>
    %144 = vector.shape_cast %143 : vector<8xf32> to vector<8x1xf32>
    %145 = arith.addf %83, %144 : vector<8x1xf32>
    %cst_99 = arith.constant 0.001953125 : f32
    %146 = vector.broadcast %cst_99 : f32 to vector<8x1xf32>
    %147 = arith.mulf %141, %146 : vector<8x1xf32>
    %cst_100 = arith.constant 0.001953125 : f32
    %148 = vector.broadcast %cst_100 : f32 to vector<8x1xf32>
    %149 = arith.mulf %145, %148 : vector<8x1xf32>
    %150 = arith.mulf %147, %147 : vector<8x1xf32>
    %151 = arith.subf %149, %150 : vector<8x1xf32>
    %cst_101 = arith.constant 0.000000e+00 : f32
    %152 = vector.broadcast %cst_101 : f32 to vector<8x1xf32>
    %153 = arith.maximumf %151, %152 : vector<8x1xf32>
    %c0_102 = arith.constant 0 : index
    %c0_103 = arith.constant 0 : index
    %154 = vector.load %arg3[%c0_102, %c0_103] : memref<8x1xf32, #tpu.memory_space<vmem>>, vector<8x1xf32>
    %cst_104 = arith.constant 9.99999974E-6 : f32
    %155 = vector.broadcast %cst_104 : f32 to vector<8x1xf32>
    %156 = arith.addf %153, %155 : vector<8x1xf32>
    %157 = math.rsqrt %156 : vector<8x1xf32>
    %158 = arith.mulf %154, %157 : vector<8x1xf32>
    %c0_105 = arith.constant 0 : index
    %c0_106 = arith.constant 0 : index
    %159 = vector.load %arg4[%c0_105, %c0_106] : memref<8x1xf32, #tpu.memory_space<vmem>>, vector<8x1xf32>
    %160 = arith.mulf %147, %158 : vector<8x1xf32>
    %161 = arith.subf %159, %160 : vector<8x1xf32>
    %c0_107 = arith.constant 0 : index
    %c0_108 = arith.constant 0 : index
    %c0_109 = arith.constant 0 : index
    %162 = vector.load %arg6[%c0_107, %c0_108, %c0_109] : memref<2x8x384xf32, #tpu.memory_space<vmem>>, vector<1x8x384xf32>
    %163 = vector.shape_cast %162 : vector<1x8x384xf32> to vector<8x384xf32>
    %164 = vector.broadcast %158 : vector<8x1xf32> to vector<8x384xf32>
    %165 = arith.mulf %163, %164 : vector<8x384xf32>
    %166 = vector.broadcast %161 : vector<8x1xf32> to vector<8x384xf32>
    %167 = arith.addf %165, %166 : vector<8x384xf32>
    %cst_110 = arith.constant 0.000000e+00 : f32
    %168 = vector.broadcast %cst_110 : f32 to vector<8x384xf32>
    %169 = arith.maximumf %167, %168 : vector<8x384xf32>
    %c0_111 = arith.constant 0 : index
    %c0_112 = arith.constant 0 : index
    %c0_113 = arith.constant 0 : index
    %170 = vector.load %arg5[%c0_111, %c0_112, %c0_113] : memref<2x8x384xf32, #tpu.memory_space<vmem>>, vector<1x8x384xf32>
    %171 = vector.shape_cast %170 : vector<1x8x384xf32> to vector<8x384xf32>
    %172 = vector.shape_cast %169 : vector<8x384xf32> to vector<1x8x384xf32>
    tpu.vector_store %arg5[%c0_111, %c0_112, %c0_113], %172 {strides = array<i32>} : memref<2x8x384xf32, #tpu.memory_space<vmem>>, vector<1x8x384xf32>,
    %c1_114 = arith.constant 1 : index
    %c0_115 = arith.constant 0 : index
    %c0_116 = arith.constant 0 : index
    %173 = vector.load %arg6[%c1_114, %c0_115, %c0_116] : memref<2x8x384xf32, #tpu.memory_space<vmem>>, vector<1x8x384xf32>
    %174 = vector.shape_cast %173 : vector<1x8x384xf32> to vector<8x384xf32>
    %175 = vector.broadcast %158 : vector<8x1xf32> to vector<8x384xf32>
    %176 = arith.mulf %174, %175 : vector<8x384xf32>
    %177 = vector.broadcast %161 : vector<8x1xf32> to vector<8x384xf32>
    %178 = arith.addf %176, %177 : vector<8x384xf32>
    %cst_117 = arith.constant 0.000000e+00 : f32
    %179 = vector.broadcast %cst_117 : f32 to vector<8x384xf32>
    %180 = arith.maximumf %178, %179 : vector<8x384xf32>
    %c1_118 = arith.constant 1 : index
    %c0_119 = arith.constant 0 : index
    %c0_120 = arith.constant 0 : index
    %181 = vector.load %arg5[%c1_118, %c0_119, %c0_120] : memref<2x8x384xf32, #tpu.memory_space<vmem>>, vector<1x8x384xf32>
    %182 = vector.shape_cast %181 : vector<1x8x384xf32> to vector<8x384xf32>
    %183 = vector.shape_cast %180 : vector<8x384xf32> to vector<1x8x384xf32>
    tpu.vector_store %arg5[%c1_118, %c0_119, %c0_120], %183 {strides = array<i32>} : memref<2x8x384xf32, #tpu.memory_space<vmem>>, vector<1x8x384xf32>,
    return
  }
  func.func @transform_0(%arg0: i32) -> (i32, i32, i32) {
    %c0_i32 = arith.constant 0 : i32
    %c0_i32_0 = arith.constant 0 : i32
    %c0_i32_1 = arith.constant 0 : i32
    %c0_i32_2 = arith.constant 0 : i32
    return %c0_i32, %c0_i32_0, %c0_i32_1 : i32, i32, i32
  }
  func.func @transform_1(%arg0: i32) -> (i32, i32, i32) {
    %c0_i32 = arith.constant 0 : i32
    %c0_i32_0 = arith.constant 0 : i32
    %c0_i32_1 = arith.constant 0 : i32
    %c0_i32_2 = arith.constant 0 : i32
    return %c0_i32, %c0_i32_0, %c0_i32_1 : i32, i32, i32
  }
  func.func @transform_2(%arg0: i32) -> (i32, i32) {
    %c0_i32 = arith.constant 0 : i32
    %c0_i32_0 = arith.constant 0 : i32
    %c0_i32_1 = arith.constant 0 : i32
    return %c0_i32, %c0_i32_0 : i32, i32
  }
  func.func @transform_3(%arg0: i32) -> (i32, i32) {
    %c0_i32 = arith.constant 0 : i32
    %c0_i32_0 = arith.constant 0 : i32
    %c0_i32_1 = arith.constant 0 : i32
    return %c0_i32, %c0_i32_0 : i32, i32
  }
  func.func @transform_4(%arg0: i32) -> (i32, i32, i32) {
    %c0_i32 = arith.constant 0 : i32
    %c0_i32_0 = arith.constant 0 : i32
    %c0_i32_1 = arith.constant 0 : i32
    %c0_i32_2 = arith.constant 0 : i32
    return %c0_i32, %c0_i32_0, %c0_i32_1 : i32, i32, i32
  }
}

</mosaic_0001>

<bundles_post_ra>
// kernel: conv_module_forward.1
= control target key start
LH: loop header
LB: loop body
LE: loop exit
PB: predicated region body
PF: predicated region fallthrough
CT: control target
= control target key end

     0   :  { %vm53_vm0 = vcmask 1043456   ;;  %vm54_vm1 = vcmask 392196   ;;  %v1468_v1 = vmov 0   ;;  %vm65_vm3 = vcmask 1041408   ;;  %s1469_s19 = smov 127   ;;  %s1471_s20 = smov 110   ;;  %s1930_s0 = inlined_call_operand.vmem [shape: bf16[2,4,432], index: 0, kind: input, shape index: {}]   ;;  %s1931_s1 = inlined_call_operand.vmem [shape: bf16[9,8,8], index: 1, kind: input, shape index: {}]   ;;  %s1932_s2 = inlined_call_operand.vmem [shape: f32[8,1], index: 2, kind: input, shape index: {}]   ;;  %s1933_s3 = inlined_call_operand.vmem [shape: f32[8,1], index: 3, kind: input, shape index: {}]   ;;  %s1934_s4 = inlined_call_operand.vmem [shape: f32[2,8,384], index: 4, kind: output, shape index: {}]  }
   0x1   :  { %vm55_vm2 = vmor %vm54_vm1, %vm53_vm0  ;;  %v57_v0 = vld [vmem:[%s1930_s0] sm:$0xff]  ;;  %52 = vst [vmem:[#allocation3] sm:$0xff] %v1468_v1  ;;  %1463 = vset.pattern.permute.xlu1 %v1468_v1  ;;  %1464 = vset.pattern.permute.xlu2 %v1468_v1  ;;  %vm66_vm4 = vcmask 390148   ;;  %v1414_v2 = vld [vmem:[%s1930_s0 + $0x8] sm:$0xff]  ;;  %s1470_s0 = smov 126   ;;  %s1472_s21 = smov 109  }
   0x2   :  { %56 = vst.msk [vmem:[#allocation3 + $0x8] sm:$0xff] %vm55_vm2, %v1468_v1  ;;  %1465 = vset.pattern.permute.xlu0 %v1468_v1  ;;  %vm67_vm5 = vmor %vm66_vm4, %vm65_vm3  ;;  %s1473_s22 = smov 108   ;;  %s1474_s23 = smov 92   ;;  %v1576_v26 = vld [vmem:[%s1931_s1] sm:$0xf]  ;;  %vm96_vm6 = vcmask 64512  }
   0x3   :  { %59 = vst [vmem:[#allocation1] ss:$2 sm:$0xff] %v57_v0  ;;  %s1475_s24 = smov 91   ;;  %s1476_s25 = smov 90   ;;  %vm209_vm7 = vcmask 1031168   ;;  %vm92_vm8 = vcmask 1039360  }
   0x4   :  { %v1379_v43 = vld [vmem:[%s1931_s1 + $0x4] sm:$0xf]  ;;  %v1386_v55 = vld [vmem:[%s1931_s1 + $0x8] sm:$0xf]  ;;  %vm277_vm9 = vcmask 900096   ;;  %vm345_vm10 = vcmask 891904  }
   0x5   :  { %vm413_vm11 = vcmask 883712   ;;  %vm481_vm12 = vcmask 752640   ;;  %vm549_vm13 = vcmask 744448   ;;  %vm617_vm14 = vcmask 736256  }
   0xa   :  { %v61_v3 = vld.sshfl [vmem:[#allocation1 + $0x8] sm:$0xff pattern:$0x75643120]  ;;  %v60_v4 = vld.sshfl [vmem:[#allocation1] sm:$0xff pattern:$0x75643120] }
   0xb   :  { %68 = vst.msk [vmem:[#allocation3 + $0x8] sm:$0x33] %vm67_vm5, %v61_v3 }
   0xc   :  { %697 = vst [vmem:[#allocation1] ss:$2 sm:$0xff] %v1414_v2 }
   0xd   :  { %64 = vst [vmem:[#allocation3] sm:$0x33] %v60_v4 }
  0x12   :  { %v70_v5 = vld [vmem:[#allocation3 + $0x8] sm:$0xff] }
  0x13   :  { %v78_v6 = vunpack.c.l.b16 %v70_v5  ;;  %v699_v7 = vld.sshfl [vmem:[#allocation1 + $0x8] sm:$0xff pattern:$0x75643120]  ;;  %v698_v8 = vld.sshfl [vmem:[#allocation1] sm:$0xff pattern:$0x75643120]  ;;  %v79_v13 = vunpack.c.h.b16 %v70_v5 }
  0x14   :  { %703 = vst.msk [vmem:[#allocation3 + $0x8] sm:$0x33] %vm67_vm5, %v699_v7  ;;  %v69_v9 = vld [vmem:[#allocation3] sm:$0xff] }
  0x15   :  { %v1510_v10 = vpack.c.b16 %v78_v6, %v78_v6  ;;  %v76_v11 = vunpack.c.l.b16 %v69_v9  ;;  %702 = vst [vmem:[#allocation3] sm:$0x33] %v698_v8  ;;  %v77_v14 = vunpack.c.h.b16 %v69_v9  ;;  %v83_v15 = vpack.c.b16 %v79_v13, %v79_v13  ;;  %v1390_v7 = vld [vmem:[%s1931_s1 + $0xc] sm:$0xf] }
  0x17   :  { %88 = vrot.lane.b32.xlu1 %v1510_v10, %s1469_s19  ;;  %v80_v12 = vpack.c.b16 %v76_v11, %v76_v11  ;;  %v1516_v16 = vpack.c.b16 %v77_v14, %v77_v14  ;;  %v158_v47 = vsel %vm53_vm0, %v1510_v10, 0 }
  0x19   :  { %84 = vrot.lane.b32.xlu0 %v80_v12, %s1469_s19  ;;  %201 = vrot.lane.b32.xlu2 %v80_v12, %s1470_s0  ;;  %v152_v22 = vsel %vm53_vm0, %v80_v12, 0  ;;  %v155_v44 = vsel %vm53_vm0, %v1516_v16, 0 }
  0x1a   :  { %167 = vmatpush.bf16.msra.mxu3 %v152_v22 }
  0x1b   :  { %v705_v17 = vld [vmem:[#allocation3 + $0x8] sm:$0xff] }
  0x1c   :  { %v704_v18 = vld [vmem:[#allocation3] sm:$0xff]  ;;  %v712_v19 = vunpack.c.l.b16 %v705_v17  ;;  %v713_v28 = vunpack.c.h.b16 %v705_v17 }
  0x1d   :  { %v711_v20 = vunpack.c.h.b16 %v704_v18  ;;  %v710_v24 = vunpack.c.l.b16 %v704_v18  ;;  %1383 = vmatmul.msk.bf16.vlgmr.msra.gmra.mxu3 %vm96_vm6, %v1576_v26 }
  0x1e   :  { %v1562_v21 = vpack.c.b16 %v712_v19, %v712_v19  ;;  %v1586_v29 = vpack.c.b16 %v713_v28, %v713_v28 }
  0x1f   :  { %90 = vrot.lane.b32.xlu1 %v83_v15, %s1469_s19  ;;  %v1565_v23 = vpack.c.b16 %v711_v20, %v711_v20  ;;  %v1571_v25 = vpack.c.b16 %v710_v24, %v710_v24  ;;  %v1398_v24 = vld [vmem:[%s1931_s1 + $0x14] sm:$0xf] }
  0x21   :  { %86 = vrot.lane.b32.xlu0 %v1516_v16, %s1469_s19  ;;  %203 = vrot.lane.b32.xlu2 %v1516_v16, %s1470_s0 }
  0x27   :  { %207 = vrot.lane.b32.xlu1 %v83_v15, %s1470_s0 }
  0x29   :  { %205 = vrot.lane.b32.xlu0 %v1510_v10, %s1470_s0  ;;  %269 = vrot.lane.b32.xlu2 %v80_v12, %s1471_s20 }
  0x2f   :  { %273 = vrot.lane.b32.xlu1 %v1510_v10, %s1471_s20 }
  0x31   :  { %271 = vrot.lane.b32.xlu0 %v1516_v16, %s1471_s20  ;;  %275 = vrot.lane.b32.xlu2 %v83_v15, %s1471_s20 }
  0x37   :  { %339 = vrot.lane.b32.xlu1 %v1516_v16, %s1472_s21 }
  0x39   :  { %337 = vrot.lane.b32.xlu0 %v80_v12, %s1472_s21  ;;  %341 = vrot.lane.b32.xlu2 %v1510_v10, %s1472_s21 }
  0x3f   :  { %405 = vrot.lane.b32.xlu1 %v80_v12, %s1473_s22 }
  0x41   :  { %343 = vrot.lane.b32.xlu0 %v83_v15, %s1472_s21  ;;  %407 = vrot.lane.b32.xlu2 %v1516_v16, %s1473_s22 }
  0x47   :  { %411 = vrot.lane.b32.xlu1 %v83_v15, %s1473_s22 }
  0x49   :  { %409 = vrot.lane.b32.xlu0 %v1510_v10, %s1473_s22  ;;  %473 = vrot.lane.b32.xlu2 %v80_v12, %s1474_s23 }
  0x4f   :  { %477 = vrot.lane.b32.xlu1 %v1510_v10, %s1474_s23 }
  0x51   :  { %475 = vrot.lane.b32.xlu0 %v1516_v16, %s1474_s23  ;;  %479 = vrot.lane.b32.xlu2 %v83_v15, %s1474_s23 }
  0x57   :  { %543 = vrot.lane.b32.xlu1 %v1516_v16, %s1475_s24 }
  0x59   :  { %541 = vrot.lane.b32.xlu0 %v80_v12, %s1475_s24  ;;  %545 = vrot.lane.b32.xlu2 %v1510_v10, %s1475_s24 }
  0x5f   :  { %609 = vrot.lane.b32.xlu1 %v80_v12, %s1476_s25 }
  0x61   :  { %547 = vrot.lane.b32.xlu0 %v83_v15, %s1475_s24  ;;  %611 = vrot.lane.b32.xlu2 %v1516_v16, %s1476_s25 }
  0x67   :  { %615 = vrot.lane.b32.xlu1 %v83_v15, %s1476_s25 }
  0x69   :  { %613 = vrot.lane.b32.xlu0 %v1510_v10, %s1476_s25  ;;  %718 = vrot.lane.b32.xlu2 %v1571_v25, %s1469_s19 }
  0x6f   :  { %722 = vrot.lane.b32.xlu1 %v1562_v21, %s1469_s19 }
  0x71   :  { %720 = vrot.lane.b32.xlu0 %v1565_v23, %s1469_s19  ;;  %724 = vrot.lane.b32.xlu2 %v1586_v29, %s1469_s19 }
  0x73   :  { %v202_v27 = vpop.permute.xlu2 %201 }
  0x77   :  { %834 = vrot.lane.b32.xlu1 %v1565_v23, %s1470_s0 }
  0x79   :  { %832 = vrot.lane.b32.xlu0 %v1571_v25, %s1470_s0  ;;  %836 = vrot.lane.b32.xlu2 %v1562_v21, %s1470_s0 }
  0x7b   :  { %v204_v30 = vpop.permute.xlu2 %203 }
  0x7c   :  { %v210_v34 = vsel %vm209_vm7, %v202_v27, %v204_v30 }
  0x7d   :  { %v217_v37 = vsel %vm53_vm0, %v210_v34, 0 }
  0x7f   :  { %898 = vrot.lane.b32.xlu1 %v1571_v25, %s1471_s20 }
  0x81   :  { %838 = vrot.lane.b32.xlu0 %v1586_v29, %s1470_s0  ;;  %900 = vrot.lane.b32.xlu2 %v1565_v23, %s1471_s20 }
  0x83   :  { %v270_v32 = vpop.permute.xlu2 %269 }
  0x87   :  { %904 = vrot.lane.b32.xlu1 %v1586_v29, %s1471_s20 }
  0x89   :  { %v89_v31 = vpop.permute.xlu1 %88  ;;  %902 = vrot.lane.b32.xlu0 %v1562_v21, %s1471_s20  ;;  %964 = vrot.lane.b32.xlu2 %v1571_v25, %s1472_s21 }
  0x8b   :  { %v85_v33 = vpop.permute.xlu0 %84  ;;  %v276_v40 = vpop.permute.xlu2 %275 }
  0x8f   :  { %968 = vrot.lane.b32.xlu1 %v1562_v21, %s1472_s21 }
  0x91   :  { %v91_v35 = vpop.permute.xlu1 %90  ;;  %966 = vrot.lane.b32.xlu0 %v1565_v23, %s1472_s21  ;;  %970 = vrot.lane.b32.xlu2 %v1586_v29, %s1472_s21 }
  0x92   :  { %v95_v36 = vsel %vm92_vm8, %v89_v31, %v91_v35 }
  0x93   :  { %v87_v38 = vpop.permute.xlu0 %86  ;;  %v107_v39 = vsel %vm53_vm0, %v95_v36, 0  ;;  %v342_v54 = vpop.permute.xlu2 %341 }
  0x94   :  { %142 = vmatpush.bf16.msra.mxu2 %v107_v39  ;;  %v93_v41 = vsel %vm92_vm8, %v85_v33, %v87_v38  ;;  %v94_v42 = vsel %vm92_vm8, %v87_v38, %v89_v31 }
  0x95   :  { %v101_v45 = vsel %vm53_vm0, %v93_v41, 0  ;;  %v104_v46 = vsel %vm53_vm0, %v94_v42, 0 }
  0x96   :  { %116 = vmatpush.bf16.msra.mxu0 %v101_v45  ;;  %129 = vmatpush.bf16.msra.mxu1 %v104_v46 }
  0x97   :  { %1382 = vmatmul.msk.bf16.vlgmr.msra.gmra.mxu2 %vm96_vm6, %v1379_v43  ;;  %1032 = vrot.lane.b32.xlu1 %v1565_v23, %s1473_s22 }
  0x98   :  { %232 = vmatpush.bf16.msrb.mxu2 %v217_v37 }
  0x99   :  { %1380 = vmatmul.msk.bf16.vlgmr.msra.gmra.mxu0 %vm96_vm6, %v1379_v43  ;;  %1381 = vmatmul.msk.bf16.vlgmr.msra.gmra.mxu1 %vm96_vm6, %v1379_v43  ;;  %v208_v48 = vpop.permute.xlu1 %207  ;;  %v1402_v43 = vld [vmem:[%s1931_s1 + $0x18] sm:$0xf] }
  0x9a   :  { %180 = vmatpush.bf16.msrb.mxu0 %v155_v44  ;;  %193 = vmatpush.bf16.msrb.mxu1 %v158_v47 }
  0x9b   :  { %1030 = vrot.lane.b32.xlu0 %v1571_v25, %s1473_s22  ;;  %v206_v49 = vpop.permute.xlu0 %205  ;;  %1034 = vrot.lane.b32.xlu2 %v1562_v21, %s1473_s22  ;;  %v408_v0 = vpop.permute.xlu2 %407 }
  0x9c   :  { %v212_v50 = vsel %vm209_vm7, %v206_v49, %v208_v48  ;;  %v211_v51 = vsel %vm209_vm7, %v204_v30, %v206_v49  ;;  %v1394_v30 = vld [vmem:[%s1931_s1 + $0x10] sm:$0xf] }
  0x9d   :  { %v223_v52 = vsel %vm53_vm0, %v212_v50, 0  ;;  %v220_v53 = vsel %vm53_vm0, %v211_v51, 0 }
  0x9e   :  { %245 = vmatpush.bf16.msrb.mxu3 %v220_v53  ;;  %258 = vmatpush.bf16.msra.mxu0 %v223_v52 }
  0x9f   :  { %1096 = vrot.lane.b32.xlu1 %v1571_v25, %s1474_s23 }
  0xa1   :  { %1388 = vmatmul.msk.bf16.vlgmr.msrb.gmra.mxu3 %vm96_vm6, %v1386_v55  ;;  %v274_v56 = vpop.permute.xlu1 %273 }
  0xa2   :  { %v280_v57 = vsel %vm277_vm9, %v274_v56, %v276_v40 }
  0xa3   :  { %1036 = vrot.lane.b32.xlu0 %v1586_v29, %s1473_s22  ;;  %v272_v58 = vpop.permute.xlu0 %271  ;;  %v291_v59 = vsel %vm53_vm0, %v280_v57, 0  ;;  %1098 = vrot.lane.b32.xlu2 %v1565_v23, %s1474_s23  ;;  %v474_v8 = vpop.permute.xlu2 %473  ;;  %v1406_v57 = vld [vmem:[%s1931_s1 + $0x1c] sm:$0xf] }
  0xa4   :  { %v278_v60 = vsel %vm277_vm9, %v270_v32, %v272_v58  ;;  %v279_v61 = vsel %vm277_vm9, %v272_v58, %v274_v56  ;;  %326 = vmatpush.bf16.msra.mxu3 %v291_v59 }
  0xa5   :  { %v285_v62 = vsel %vm53_vm0, %v278_v60, 0  ;;  %v288_v63 = vsel %vm53_vm0, %v279_v61, 0 }
  0xa6   :  { %300 = vmatpush.bf16.msra.mxu1 %v285_v62  ;;  %313 = vmatpush.bf16.msra.mxu2 %v288_v63 }
  0xa7   :  { %1387 = vmatmul.msk.bf16.vlgmr.msrb.gmra.mxu2 %vm96_vm6, %v1386_v55  ;;  %1102 = vrot.lane.b32.xlu1 %v1586_v29, %s1474_s23 }
  0xa9   :  { %1384 = vmatmul.msk.bf16.vlgmr.msrb.gmra.mxu0 %vm96_vm6, %v1576_v26  ;;  %1385 = vmatmul.msk.bf16.vlgmr.msrb.gmra.mxu1 %vm96_vm6, %v1576_v26  ;;  %v340_v1 = vpop.permute.xlu1 %339 }
  0xaa   :  { %v347_v2 = vsel %vm345_vm10, %v340_v1, %v342_v54 }
  0xab   :  { %1100 = vrot.lane.b32.xlu0 %v1562_v21, %s1474_s23  ;;  %v338_v3 = vpop.permute.xlu0 %337  ;;  %v356_v4 = vsel %vm53_vm0, %v347_v2, 0  ;;  %1162 = vrot.lane.b32.xlu2 %v1571_v25, %s1475_s24  ;;  %v480_v16 = vpop.permute.xlu2 %479  ;;  %v784_v2 = vsel %vm53_vm0, %v1571_v25, 0 }
  0xac   :  { %v346_v5 = vsel %vm345_vm10, %v338_v3, %v340_v1  ;;  %381 = vmatpush.bf16.msrb.mxu1 %v356_v4 }
  0xad   :  { %v353_v6 = vsel %vm53_vm0, %v346_v5, 0 }
  0xae   :  { %368 = vmatpush.bf16.msrb.mxu0 %v353_v6 }
  0xaf   :  { %1166 = vrot.lane.b32.xlu1 %v1562_v21, %s1475_s24 }
  0xb1   :  { %1393 = vmatmul.msk.bf16.vlgmr.msra.gmra.mxu3 %vm96_vm6, %v1390_v7  ;;  %v406_v9 = vpop.permute.xlu1 %405 }
  0xb2   :  { %v414_v10 = vsel %vm413_vm11, %v406_v9, %v408_v0 }
  0xb3   :  { %1164 = vrot.lane.b32.xlu0 %v1565_v23, %s1475_s24  ;;  %v344_v11 = vpop.permute.xlu0 %343  ;;  %v421_v12 = vsel %vm53_vm0, %v414_v10, 0  ;;  %1168 = vrot.lane.b32.xlu2 %v1586_v29, %s1475_s24  ;;  %v546_v28 = vpop.permute.xlu2 %545 }
  0xb4   :  { %v348_v13 = vsel %vm345_vm10, %v342_v54, %v344_v11  ;;  %436 = vmatpush.bf16.msrb.mxu3 %v421_v12  ;;  %v1410_v11 = vld [vmem:[%s1931_s1 + $0x20] sm:$0xf] }
  0xb5   :  { %v359_v14 = vsel %vm53_vm0, %v348_v13, 0 }
  0xb6   :  { %394 = vmatpush.bf16.msrb.mxu2 %v359_v14 }
  0xb7   :  { %1392 = vmatmul.msk.bf16.vlgmr.msra.gmra.mxu2 %vm96_vm6, %v1390_v7  ;;  %1230 = vrot.lane.b32.xlu1 %v1565_v23, %s1476_s25 }
  0xb9   :  { %1389 = vmatmul.msk.bf16.vlgmr.msra.gmra.mxu0 %vm96_vm6, %v1386_v55  ;;  %1391 = vmatmul.msk.bf16.vlgmr.msra.gmra.mxu1 %vm96_vm6, %v1390_v7  ;;  %v412_v15 = vpop.permute.xlu1 %411 }
  0xbb   :  { %1228 = vrot.lane.b32.xlu0 %v1571_v25, %s1476_s25  ;;  %v410_v17 = vpop.permute.xlu0 %409  ;;  %1232 = vrot.lane.b32.xlu2 %v1562_v21, %s1476_s25  ;;  %v612_v42 = vpop.permute.xlu2 %611  ;;  %v1415_v25 = vld [vmem:[%s1931_s1 + $0x4] sm:$0xf] }
  0xbc   :  { %v415_v18 = vsel %vm413_vm11, %v408_v0, %v410_v17  ;;  %v416_v19 = vsel %vm413_vm11, %v410_v17, %v412_v15  ;;  %v787_v0 = vsel %vm53_vm0, %v1565_v23, 0 }
  0xbd   :  { %v424_v20 = vsel %vm53_vm0, %v415_v18, 0  ;;  %v427_v22 = vsel %vm53_vm0, %v416_v19, 0  ;;  %v790_v18 = vsel %vm53_vm0, %v1562_v21, 0 }
  0xbe   :  { %449 = vmatpush.bf16.msra.mxu0 %v424_v20  ;;  %462 = vmatpush.bf16.msra.mxu1 %v427_v22 }
  0xc1   :  { %1399 = vmatmul.msk.bf16.vlgmr.msrb.gmra.mxu3 %vm96_vm6, %v1398_v24  ;;  %v478_v26 = vpop.permute.xlu1 %477 }
  0xc2   :  { %v484_v33 = vsel %vm481_vm12, %v478_v26, %v480_v16  ;;  %v169_v16 = vpop.f32.mrf.mxu3 }
  0xc3   :  { %1234 = vrot.lane.b32.xlu0 %v1586_v29, %s1476_s25  ;;  %v476_v27 = vpop.permute.xlu0 %475  ;;  %v495_v29 = vsel %vm53_vm0, %v484_v33, 0  ;;  %v719_v50 = vpop.permute.xlu2 %718 }
  0xc4   :  { %v482_v31 = vsel %vm481_vm12, %v474_v8, %v476_v27  ;;  %v483_v32 = vsel %vm481_vm12, %v476_v27, %v478_v26 }
  0xc5   :  { %v489_v34 = vsel %vm53_vm0, %v482_v31, 0  ;;  %v492_v35 = vsel %vm53_vm0, %v483_v32, 0 }
  0xc6   :  { %517 = vmatpush.bf16.msra.mxu3 %v492_v35  ;;  %504 = vmatpush.bf16.msra.mxu2 %v489_v34 }
  0xc7   :  { %1397 = vmatmul.msk.bf16.vlgmr.msrb.gmra.mxu2 %vm96_vm6, %v1394_v30 }
  0xc9   :  { %1395 = vmatmul.msk.bf16.vlgmr.msrb.gmra.mxu0 %vm96_vm6, %v1394_v30  ;;  %1396 = vmatmul.msk.bf16.vlgmr.msrb.gmra.mxu1 %vm96_vm6, %v1394_v30  ;;  %v544_v36 = vpop.permute.xlu1 %543 }
  0xca   :  { %530 = vmatpush.bf16.msrb.mxu0 %v495_v29  ;;  %v551_v37 = vsel %vm549_vm13, %v544_v36, %v546_v28  ;;  %v171_v26 = vpop.f32.mrf.mxu3 }
  0xcb   :  { %v542_v38 = vpop.permute.xlu0 %541  ;;  %v560_v39 = vsel %vm53_vm0, %v551_v37, 0  ;;  %v725_v58 = vpop.permute.xlu2 %724 }
  0xcc   :  { %v550_v40 = vsel %vm549_vm13, %v542_v38, %v544_v36  ;;  %585 = vmatpush.bf16.msrb.mxu2 %v560_v39  ;;  %v1422_v39 = vld [vmem:[%s1931_s1 + $0x8] sm:$0xf] }
  0xcd   :  { %v557_v41 = vsel %vm53_vm0, %v550_v40, 0 }
  0xce   :  { %572 = vmatpush.bf16.msrb.mxu1 %v557_v41 }
  0xd1   :  { %1404 = vmatmul.msk.bf16.vlgmr.msra.gmra.mxu3 %vm96_vm6, %v1402_v43  ;;  %v610_v44 = vpop.permute.xlu1 %609 }
  0xd2   :  { %v618_v47 = vsel %vm617_vm14, %v610_v44, %v612_v42 }
  0xd3   :  { %v548_v45 = vpop.permute.xlu0 %547  ;;  %v625_v49 = vsel %vm53_vm0, %v618_v47, 0  ;;  %v837_v5 = vpop.permute.xlu2 %836 }
  0xd4   :  { %v552_v46 = vsel %vm549_vm13, %v546_v28, %v548_v45 }
  0xd5   :  { %v563_v48 = vsel %vm53_vm0, %v552_v46, 0 }
  0xd6   :  { %598 = vmatpush.bf16.msrb.mxu3 %v563_v48 }
  0xd7   :  { %1403 = vmatmul.msk.bf16.vlgmr.msra.gmra.mxu2 %vm96_vm6, %v1402_v43 }
  0xd9   :  { %1400 = vmatmul.msk.bf16.vlgmr.msra.gmra.mxu0 %vm96_vm6, %v1398_v24  ;;  %1401 = vmatmul.msk.bf16.vlgmr.msra.gmra.mxu1 %vm96_vm6, %v1398_v24  ;;  %v616_v51 = vpop.permute.xlu1 %615  ;;  %v706_v24 = vld [vmem:[%s1931_s1] sm:$0xf] }
  0xda   :  { %640 = vmatpush.bf16.msra.mxu0 %v625_v49 }
  0xdb   :  { %v614_v52 = vpop.permute.xlu0 %613  ;;  %v901_v8 = vpop.permute.xlu2 %900 }
  0xdc   :  { %v619_v53 = vsel %vm617_vm14, %v612_v42, %v614_v52  ;;  %v620_v54 = vsel %vm617_vm14, %v614_v52, %v616_v51 }
  0xdd   :  { %v628_v55 = vsel %vm53_vm0, %v619_v53, 0  ;;  %v631_v56 = vsel %vm53_vm0, %v620_v54, 0 }
  0xde   :  { %653 = vmatpush.bf16.msra.mxu1 %v628_v55  ;;  %666 = vmatpush.bf16.msra.mxu2 %v631_v56 }
  0xe1   :  { %1409 = vmatmul.msk.bf16.vlgmr.msrb.gmra.mxu3 %vm96_vm6, %v1406_v57  ;;  %v723_v59 = vpop.permute.xlu1 %722 }
  0xe2   :  { %v728_v63 = vsel %vm92_vm8, %v723_v59, %v725_v58 }
  0xe3   :  { %v721_v60 = vpop.permute.xlu0 %720  ;;  %v739_v4 = vsel %vm53_vm0, %v728_v63, 0  ;;  %v965_v20 = vpop.permute.xlu2 %964 }
  0xe4   :  { %v726_v61 = vsel %vm92_vm8, %v719_v50, %v721_v60  ;;  %v727_v62 = vsel %vm92_vm8, %v721_v60, %v723_v59 }
  0xe5   :  { %v733_v1 = vsel %vm53_vm0, %v726_v61, 0  ;;  %v736_v3 = vsel %vm53_vm0, %v727_v62, 0  ;;  %v1430_v61 = vld [vmem:[%s1931_s1 + $0x10] sm:$0xf] }
  0xe6   :  { %748 = vmatpush.bf16.msra.mxu3 %v733_v1 }
  0xe7   :  { %1408 = vmatmul.msk.bf16.vlgmr.msrb.gmra.mxu2 %vm96_vm6, %v1406_v57 }
  0xe8   :  { %799 = vmatpush.bf16.msrb.mxu2 %v784_v2 }
  0xe9   :  { %1405 = vmatmul.msk.bf16.vlgmr.msrb.gmra.mxu0 %vm96_vm6, %v1402_v43  ;;  %1407 = vmatmul.msk.bf16.vlgmr.msrb.gmra.mxu1 %vm96_vm6, %v1406_v57  ;;  %v835_v23 = vpop.permute.xlu1 %834 }
  0xea   :  { %812 = vmatpush.bf16.msrb.mxu3 %v787_v0  ;;  %761 = vmatpush.bf16.msrb.mxu0 %v736_v3  ;;  %v841_v9 = vsel %vm209_vm7, %v835_v23, %v837_v5  ;;  %v1426_v3 = vld [vmem:[%s1931_s1 + $0xc] sm:$0xf] }
  0xeb   :  { %774 = vmatpush.bf16.msrb.mxu1 %v739_v4  ;;  %v833_v6 = vpop.permute.xlu0 %832  ;;  %v850_v14 = vsel %vm53_vm0, %v841_v9, 0  ;;  %v971_v33 = vpop.permute.xlu2 %970 }
  0xec   :  { %v840_v12 = vsel %vm209_vm7, %v833_v6, %v835_v23 }
  0xed   :  { %v847_v17 = vsel %vm53_vm0, %v840_v12, 0 }
  0xf1   :  { %1416 = vmatmul.msk.bf16.vlgmr.msra.gmra.mxu3 %vm96_vm6, %v1415_v25  ;;  %v899_v7 = vpop.permute.xlu1 %898 }
  0xf2   :  { %v906_v30 = vsel %vm277_vm9, %v899_v7, %v901_v8 }
  0xf3   :  { %v839_v10 = vpop.permute.xlu0 %838  ;;  %v913_v29 = vsel %vm53_vm0, %v906_v30, 0 }
  0xf4   :  { %v842_v13 = vsel %vm209_vm7, %v837_v5, %v839_v10 }
  0xf5   :  { %v853_v15 = vsel %vm53_vm0, %v842_v13, 0  ;;  %v1035_v40 = vpop.permute.xlu2 %1034 }
  0xf6   :  { %888 = vmatpush.bf16.msra.mxu3 %v853_v15 }
  0xf7   :  { %1413 = vmatmul.msk.bf16.vlgmr.msra.gmra.mxu2 %vm96_vm6, %v1410_v11 }
  0xf8   :  { %875 = vmatpush.bf16.msra.mxu2 %v850_v14 }
  0xf9   :  { %1411 = vmatmul.msk.bf16.vlgmr.msra.gmra.mxu0 %vm96_vm6, %v1410_v11  ;;  %1412 = vmatmul.msk.bf16.vlgmr.msra.gmra.mxu1 %vm96_vm6, %v1410_v11  ;;  %v905_v19 = vpop.permute.xlu1 %904 }
  0xfa   :  { %825 = vmatpush.bf16.msra.mxu0 %v790_v18  ;;  %862 = vmatpush.bf16.msra.mxu1 %v847_v17 }
  0xfb   :  { %v903_v22 = vpop.permute.xlu0 %902 }
  0xfc   :  { %v908_v21 = vsel %vm277_vm9, %v903_v22, %v905_v19  ;;  %v907_v31 = vsel %vm277_vm9, %v901_v8, %v903_v22 }
  0xfd   :  { %v919_v34 = vsel %vm53_vm0, %v908_v21, 0  ;;  %v916_v36 = vsel %vm53_vm0, %v907_v31, 0  ;;  %v1099_v54 = vpop.permute.xlu2 %1098 }
 0x101   :  { %1420 = vmatmul.msk.bf16.vlgmr.msrb.gmra.mxu3 %vm96_vm6, %v706_v24  ;;  %v969_v27 = vpop.permute.xlu1 %968 }
 0x102   :  { %v974_v46 = vsel %vm345_vm10, %v969_v27, %v971_v33 }
 0x103   :  { %v967_v28 = vpop.permute.xlu0 %966  ;;  %v985_v53 = vsel %vm53_vm0, %v974_v46, 0 }
 0x104   :  { %v972_v32 = vsel %vm345_vm10, %v965_v20, %v967_v28  ;;  %v973_v45 = vsel %vm345_vm10, %v967_v28, %v969_v27  ;;  %v1434_v20 = vld [vmem:[%s1931_s1 + $0x14] sm:$0xf] }
 0x105   :  { %v979_v35 = vsel %vm53_vm0, %v972_v32, 0  ;;  %v982_v52 = vsel %vm53_vm0, %v973_v45, 0  ;;  %v1163_v1 = vpop.permute.xlu2 %1162 }
 0x106   :  { %994 = vmatpush.bf16.msrb.mxu3 %v979_v35 }
 0x107   :  { %1419 = vmatmul.msk.bf16.vlgmr.msrb.gmra.mxu2 %vm96_vm6, %v706_v24 }
 0x108   :  { %954 = vmatpush.bf16.msrb.mxu2 %v919_v34 }
 0x109   :  { %1417 = vmatmul.msk.bf16.vlgmr.msrb.gmra.mxu0 %vm96_vm6, %v1415_v25  ;;  %1418 = vmatmul.msk.bf16.vlgmr.msrb.gmra.mxu1 %vm96_vm6, %v1415_v25  ;;  %v1033_v37 = vpop.permute.xlu1 %1032 }
 0x10a   :  { %928 = vmatpush.bf16.msrb.mxu0 %v913_v29  ;;  %941 = vmatpush.bf16.msrb.mxu1 %v916_v36  ;;  %v1039_v41 = vsel %vm413_vm11, %v1033_v37, %v1035_v40 }
 0x10b   :  { %v1048_v42 = vsel %vm53_vm0, %v1039_v41, 0  ;;  %v1438_v41 = vld [vmem:[%s1931_s1 + $0x18] sm:$0xf] }
 0x10d   :  { %v1031_v38 = vpop.permute.xlu0 %1030  ;;  %v1169_v17 = vpop.permute.xlu2 %1168 }
 0x10e   :  { %v1038_v43 = vsel %vm413_vm11, %v1031_v38, %v1033_v37 }
 0x10f   :  { %v1045_v48 = vsel %vm53_vm0, %v1038_v43, 0 }
 0x111   :  { %1425 = vmatmul.msk.bf16.vlgmr.msra.gmra.mxu3 %vm96_vm6, %v1422_v39  ;;  %v1097_v44 = vpop.permute.xlu1 %1096 }
 0x112   :  { %1073 = vmatpush.bf16.msra.mxu3 %v1048_v42  ;;  %v1104_v5 = vsel %vm481_vm12, %v1097_v44, %v1099_v54 }
 0x113   :  { %v1111_v11 = vsel %vm53_vm0, %v1104_v5, 0 }
 0x115   :  { %v1037_v47 = vpop.permute.xlu0 %1036  ;;  %v1233_v42 = vpop.permute.xlu2 %1232 }
 0x116   :  { %v118_v49 = vpop.f32.mrf.mxu0  ;;  %v131_v50 = vpop.f32.mrf.mxu1  ;;  %v1040_v4 = vsel %vm413_vm11, %v1035_v40, %v1037_v47 }
 0x117   :  { %v170_v51 = vadd.f32 %v169_v16, %v118_v49  ;;  %1424 = vmatmul.msk.bf16.vlgmr.msra.gmra.mxu2 %vm96_vm6, %v1422_v39  ;;  %v1051_v10 = vsel %vm53_vm0, %v1040_v4, 0 }
 0x118   :  { %1060 = vmatpush.bf16.msra.mxu2 %v1045_v48 }
 0x119   :  { %1421 = vmatmul.msk.bf16.vlgmr.msra.gmra.mxu0 %vm96_vm6, %v706_v24  ;;  %1423 = vmatmul.msk.bf16.vlgmr.msra.gmra.mxu1 %vm96_vm6, %v1422_v39  ;;  %v1103_v56 = vpop.permute.xlu1 %1102 }
 0x11a   :  { %v144_v55 = vpop.f32.mrf.mxu2  ;;  %1007 = vmatpush.bf16.msra.mxu0 %v982_v52  ;;  %1020 = vmatpush.bf16.msra.mxu1 %v985_v53 }
 0x11d   :  { %v1101_v57 = vpop.permute.xlu0 %1100 }
 0x11e   :  { %v1106_v58 = vsel %vm481_vm12, %v1101_v57, %v1103_v56  ;;  %v120_v59 = vpop.f32.mrf.mxu0  ;;  %v133_v60 = vpop.f32.mrf.mxu1  ;;  %v1105_v0 = vsel %vm481_vm12, %v1099_v54, %v1101_v57  ;;  %v1446_v56 = vld [vmem:[%s1931_s1 + $0x20] sm:$0xf]  ;;  %v18_v57 = vlaneseq }
 0x11f   :  { %v1117_v62 = vsel %vm53_vm0, %v1106_v58, 0  ;;  %v1114_v23 = vsel %vm53_vm0, %v1105_v0, 0 }
 0x120   :  { %v19_v59 = vand.u32 127, %v18_v57 }
 0x121   :  { %1431 = vmatmul.msk.bf16.vlgmr.msrb.gmra.mxu3 %vm96_vm6, %v1430_v61  ;;  %v1167_v6 = vpop.permute.xlu1 %1166 }
 0x122   :  { %v146_v63 = vpop.f32.mrf.mxu2  ;;  %1152 = vmatpush.bf16.msrb.mxu3 %v1117_v62  ;;  %v1172_v28 = vsel %vm549_vm13, %v1167_v6, %v1169_v17  ;;  %v20_v0 = vadd.s32 128, %v19_v59 }
 0x123   :  { %v1183_v33 = vsel %vm53_vm0, %v1172_v28, 0 }
 0x124   :  { %v247_v2 = vpop.f32.mrf.mxu3  ;;  %v23_v4 = vcvt.s32.f32 %v20_v0 }
 0x125   :  { %v1165_v12 = vpop.permute.xlu0 %1164 }
 0x126   :  { %v182_v25 = vpop.f32.mrf.mxu0  ;;  %v195_v7 = vpop.f32.mrf.mxu1  ;;  %v1170_v31 = vsel %vm549_vm13, %v1163_v1, %v1165_v12  ;;  %v1171_v32 = vsel %vm549_vm13, %v1165_v12, %v1167_v6  ;;  %v1866_v1 = vadd.s32 256, %v19_v59 }
 0x127   :  { %v183_v8 = vadd.f32 %v182_v25, %v131_v50  ;;  %v1811_v9 = vadd.f32 %v195_v7, %v144_v55  ;;  %1429 = vmatmul.msk.bf16.vlgmr.msrb.gmra.mxu2 %vm96_vm6, %v1426_v3  ;;  %v1177_v29 = vsel %vm53_vm0, %v1170_v31, 0  ;;  %v1180_v36 = vsel %vm53_vm0, %v1171_v32, 0 }
 0x128   :  { %1139 = vmatpush.bf16.msrb.mxu2 %v1114_v23  ;;  %v24_v23 = vcvt.s32.f32 %v1866_v1  ;;  %vm45_vm2 = vcmp.lt.s32.totalorder %v1866_v1, 288 }
 0x129   :  { %v1816_v13 = vadd.f32 %v247_v2, %v183_v8  ;;  %1427 = vmatmul.msk.bf16.vlgmr.msrb.gmra.mxu0 %vm96_vm6, %v1426_v3  ;;  %1428 = vmatmul.msk.bf16.vlgmr.msrb.gmra.mxu1 %vm96_vm6, %v1426_v3  ;;  %v1231_v24 = vpop.permute.xlu1 %1230  ;;  %v22_v3 = vcvt.s32.f32 %v19_v59  ;;  %v26_v8 = vadd.f32 0.5, %v23_v4 }
 0x12a   :  { %v234_v14 = vpop.f32.mrf.mxu2  ;;  %1086 = vmatpush.bf16.msrb.mxu0 %v1051_v10  ;;  %1126 = vmatpush.bf16.msrb.mxu1 %v1111_v11  ;;  %v1237_v46 = vsel %vm617_vm14, %v1231_v24, %v1233_v42  ;;  %v27_v10 = vadd.f32 0.5, %v24_v23 }
 0x12b   :  { %v1820_v15 = vadd.f32 %v234_v14, %v170_v51  ;;  %v1246_v50 = vsel %vm53_vm0, %v1237_v46, 0  ;;  %v25_v7 = vadd.f32 0.5, %v22_v3  ;;  %v29_v14 = vmul.f32 0.055555556, %v26_v8 }
 0x12c   :  { %v249_v16 = vpop.f32.mrf.mxu3  ;;  %v30_v17 = vmul.f32 0.055555556, %v27_v10 }
 0x12d   :  { %v1229_v22 = vpop.permute.xlu0 %1228  ;;  %v28_v12 = vmul.f32 0.055555556, %v25_v7 }
 0x12e   :  { %v184_v18 = vpop.f32.mrf.mxu0  ;;  %v197_v19 = vpop.f32.mrf.mxu1  ;;  %v1236_v26 = vsel %vm617_vm14, %v1229_v22, %v1231_v24  ;;  %v32_v22 = vfloor.f32 %v29_v14  ;;  %v33_v24 = vfloor.f32 %v30_v17 }
 0x12f   :  { %v1243_v27 = vsel %vm53_vm0, %v1236_v26, 0 }
 0x130   :  { %v35_v32 = vmul.f32 18.0, %v32_v22 }
 0x131   :  { %1436 = vmatmul.msk.bf16.vlgmr.msra.gmra.mxu3 %vm96_vm6, %v1434_v20 }
 0x132   :  { %v236_v21 = vpop.f32.mrf.mxu2  ;;  %1258 = vmatpush.bf16.msra.mxu3 %v1243_v27 }
 0x134   :  { %v1829_v30 = vpop.f32.mrf.mxu3 }
 0x135   :  { %v1235_v43 = vpop.permute.xlu0 %1234 }
 0x136   :  { %v1834_v34 = vpop.f32.mrf.mxu0  ;;  %v1836_v35 = vpop.f32.mrf.mxu1  ;;  %v1238_v47 = vsel %vm617_vm14, %v1233_v42, %v1235_v43 }
 0x137   :  { %1435 = vmatmul.msk.bf16.vlgmr.msra.gmra.mxu2 %vm96_vm6, %v1434_v20  ;;  %v1249_v51 = vsel %vm53_vm0, %v1238_v47, 0  ;;  %v266_v26 = vadd.f32 %v1834_v34, %v1811_v9  ;;  %v332_v21 = vadd.f32 %v1836_v35, %v1820_v15  ;;  %v38_v9 = vsub.f32 %v23_v4, %v35_v32 }
 0x138   :  { %1218 = vmatpush.bf16.msra.mxu2 %v1183_v33 }
 0x139   :  { %1432 = vmatmul.msk.bf16.vlgmr.msra.gmra.mxu0 %vm96_vm6, %v1430_v61  ;;  %1433 = vmatmul.msk.bf16.vlgmr.msra.gmra.mxu1 %vm96_vm6, %v1430_v61  ;;  %v1442_v61 = vld [vmem:[%s1931_s1 + $0x1c] sm:$0xf]  ;;  %vm41_vm0 = vcmp.lt.f32.partialorder %v38_v9, 16.0 }
 0x13a   :  { %v1843_v37 = vpop.f32.mrf.mxu2  ;;  %1192 = vmatpush.bf16.msra.mxu0 %v1177_v29  ;;  %1205 = vmatpush.bf16.msra.mxu1 %v1180_v36  ;;  %v36_v29 = vmul.f32 18.0, %v33_v24 }
 0x13b   :  { %v333_v28 = vadd.f32 %v1843_v37, %v1816_v13 }
 0x13c   :  { %v330_v38 = vpop.f32.mrf.mxu3 }
 0x13e   :  { %v262_v39 = vpop.f32.mrf.mxu0  ;;  %v304_v40 = vpop.f32.mrf.mxu1 }
 0x13f   :  { %v334_v39 = vadd.f32 %v1829_v30, %v266_v26 }
 0x141   :  { %1441 = vmatmul.msk.bf16.vlgmr.msrb.gmra.mxu3 %vm96_vm6, %v1438_v41 }
 0x142   :  { %v317_v44 = vpop.f32.mrf.mxu2 }
 0x143   :  { %v39_v44 = vsub.f32 %v24_v23, %v36_v29 }
 0x144   :  { %v1849_v45 = vpop.f32.mrf.mxu3 }
 0x145   :  { %vm42_vm1 = vcmp.lt.f32.partialorder %v39_v44, 16.0 }
 0x146   :  { %v370_v48 = vpop.f32.mrf.mxu0  ;;  %v383_v49 = vpop.f32.mrf.mxu1  ;;  %vm48_vm3 = vmand %vm42_vm1, %vm45_vm2 }
 0x147   :  { %1440 = vmatmul.msk.bf16.vlgmr.msrb.gmra.mxu2 %vm96_vm6, %v1438_v41  ;;  %v400_v36 = vadd.f32 %v370_v48, %v332_v21  ;;  %v401_v38 = vadd.f32 %v383_v49, %v333_v28 }
 0x149   :  { %1437 = vmatmul.msk.bf16.vlgmr.msrb.gmra.mxu0 %vm96_vm6, %v1434_v20  ;;  %1439 = vmatmul.msk.bf16.vlgmr.msrb.gmra.mxu1 %vm96_vm6, %v1438_v41  ;;  %v31_v20 = vfloor.f32 %v28_v12  ;;  %v468_v15 = vadd.f32 %v1849_v45, %v400_v36 }
 0x14a   :  { %v396_v52 = vpop.f32.mrf.mxu2  ;;  %1271 = vmatpush.bf16.msrb.mxu0 %v1246_v50  ;;  %1284 = vmatpush.bf16.msrb.mxu1 %v1249_v51  ;;  %v1477_v50 = vmov 0.0  }
 0x14b   :  { %v34_v31 = vmul.f32 18.0, %v31_v20  ;;  %v402_v34 = vadd.f32 %v396_v52, %v334_v39  ;;  %v1894_v59 = vsel %vm48_vm3, 1.0, %v1477_v50 }
 0x14c   :  { %v440_v53 = vpop.f32.mrf.mxu3 }
 0x14d   :  { %v37_v43 = vsub.f32 %v22_v3, %v34_v31  ;;  %v1884_v53 = vsel %vm41_vm0, 1.0, %v1477_v50 }
 0x14e   :  { %v372_v54 = vpop.f32.mrf.mxu0  ;;  %v385_v55 = vpop.f32.mrf.mxu1 }
 0x14f   :  { %vm40_vm15 = vcmp.lt.f32.partialorder %v37_v43, 16.0 }
 0x150   :  { %v1882_v51 = vsel %vm40_vm15, 1.0, %v1477_v50 }
 0x151   :  { %1447 = vmatmul.msk.bf16.vlgmr.msra.gmra.mxu3 %vm96_vm6, %v1446_v56 }
 0x152   :  { %v398_v58 = vpop.f32.mrf.mxu2 }
 0x154   :  { %v519_v60 = vpop.f32.mrf.mxu3 }
 0x156   :  { %v451_v62 = vpop.f32.mrf.mxu0  ;;  %v464_v63 = vpop.f32.mrf.mxu1 }
 0x157   :  { %1445 = vmatmul.msk.bf16.vlgmr.msra.gmra.mxu2 %vm96_vm6, %v1442_v61  ;;  %v469_v42 = vadd.f32 %v451_v62, %v401_v38  ;;  %v470_v35 = vadd.f32 %v464_v63, %v402_v34 }
 0x159   :  { %1443 = vmatmul.msk.bf16.vlgmr.msra.gmra.mxu0 %vm96_vm6, %v1442_v61  ;;  %1444 = vmatmul.msk.bf16.vlgmr.msra.gmra.mxu1 %vm96_vm6, %v1442_v61  ;;  %v537_v13 = vadd.f32 %v519_v60, %v469_v42 }
 0x15a   :  { %v506_v2 = vpop.f32.mrf.mxu2 }
 0x15b   :  { %v536_v37 = vadd.f32 %v506_v2, %v468_v15 }
 0x15c   :  { %v521_v5 = vpop.f32.mrf.mxu3 }
 0x15e   :  { %v453_v6 = vpop.f32.mrf.mxu0  ;;  %v466_v25 = vpop.f32.mrf.mxu1 }
 0x162   :  { %v508_v11 = vpop.f32.mrf.mxu2 }
 0x164   :  { %v600_v16 = vpop.f32.mrf.mxu3 }
 0x166   :  { %v532_v18 = vpop.f32.mrf.mxu0  ;;  %v574_v19 = vpop.f32.mrf.mxu1 }
 0x167   :  { %v538_v30 = vadd.f32 %v532_v18, %v470_v35  ;;  %v604_v48 = vadd.f32 %v574_v19, %v536_v37 }
 0x169   :  { %1448 = vmatmul.msk.bf16.vlgmr.msrb.gmra.mxu0 %vm96_vm6, %v1446_v56  ;;  %1449 = vmatmul.msk.bf16.vlgmr.msrb.gmra.mxu1 %vm96_vm6, %v1446_v56  ;;  %v606_v56 = vadd.f32 %v600_v16, %v538_v30 }
 0x16a   :  { %v587_v27 = vpop.f32.mrf.mxu2 }
 0x16b   :  { %v605_v49 = vadd.f32 %v587_v27, %v537_v13 }
 0x16c   :  { %v602_v33 = vpop.f32.mrf.mxu3 }
 0x16e   :  { %v534_v40 = vpop.f32.mrf.mxu0  ;;  %v576_v41 = vpop.f32.mrf.mxu1 }
 0x172   :  { %v589_v46 = vpop.f32.mrf.mxu2 }
 0x174   :  { %v750_v47 = vpop.f32.mrf.mxu3 }
 0x176   :  { %v642_v52 = vpop.f32.mrf.mxu0  ;;  %v655_v45 = vpop.f32.mrf.mxu1 }
 0x177   :  { %v1886_v54 = vadd.f32 %v642_v52, %v604_v48  ;;  %v1888_v55 = vadd.f32 %v655_v45, %v605_v49 }
 0x179   :  { %v678_v57 = vmul.f32 %v1886_v54, %v1882_v51  ;;  %v679_v58 = vmul.f32 %v1888_v55, %v1884_v53 }
 0x17a   :  { %v668_v60 = vpop.f32.mrf.mxu2 }
 0x17b   :  { %v686_v61 = vmul.f32 %v678_v57, %v678_v57  ;;  %v687_v62 = vmul.f32 %v679_v58, %v679_v58  ;;  %v1896_v63 = vadd.f32 %v668_v60, %v606_v56  ;;  %v681_v2 = vadd.f32 %v679_v58, %v678_v57 }
 0x17c   :  { %v752_v0 = vpop.f32.mrf.mxu3 }
 0x17d   :  { %v680_v1 = vmul.f32 %v1896_v63, %v1894_v59  ;;  %v689_v6 = vadd.f32 %v687_v62, %v686_v61 }
 0x17e   :  { %v644_v3 = vpop.f32.mrf.mxu0  ;;  %v657_v4 = vpop.f32.mrf.mxu1 }
 0x17f   :  { %v682_v5 = vadd.f32 %v681_v2, %v680_v1  ;;  %v688_v23 = vmul.f32 %v680_v1, %v680_v1 }
 0x181   :  { %683 = vadd.xlane.f32.xlu1 %v682_v5  ;;  %v690_v25 = vadd.f32 %v689_v6, %v688_v23 }
 0x182   :  { %v670_v7 = vpop.f32.mrf.mxu2 }
 0x183   :  { %691 = vadd.xlane.f32.xlu0 %v690_v25 }
 0x184   :  { %v814_v8 = vpop.f32.mrf.mxu3 }
 0x186   :  { %v763_v10 = vpop.f32.mrf.mxu0  ;;  %v776_v11 = vpop.f32.mrf.mxu1 }
 0x187   :  { %v815_v12 = vadd.f32 %v814_v8, %v763_v10 }
 0x18a   :  { %v801_v14 = vpop.f32.mrf.mxu2 }
 0x18b   :  { %v802_v16 = vadd.f32 %v801_v14, %v750_v47 }
 0x18c   :  { %v816_v17 = vpop.f32.mrf.mxu3 }
 0x18e   :  { %v765_v18 = vpop.f32.mrf.mxu0  ;;  %v778_v19 = vpop.f32.mrf.mxu1 }
 0x192   :  { %v803_v20 = vpop.f32.mrf.mxu2 }
 0x194   :  { %v890_v22 = vpop.f32.mrf.mxu3 }
 0x196   :  { %v827_v24 = vpop.f32.mrf.mxu0  ;;  %v864_v26 = vpop.f32.mrf.mxu1 }
 0x197   :  { %v828_v27 = vadd.f32 %v827_v24, %v776_v11  ;;  %v894_v21 = vadd.f32 %v864_v26, %v802_v16 }
 0x199   :  { %v896_v28 = vadd.f32 %v890_v22, %v828_v27 }
 0x19a   :  { %v877_v31 = vpop.f32.mrf.mxu2 }
 0x19b   :  { %v895_v32 = vadd.f32 %v877_v31, %v815_v12 }
 0x19c   :  { %v892_v33 = vpop.f32.mrf.mxu3 }
 0x19e   :  { %v829_v29 = vpop.f32.mrf.mxu0  ;;  %v866_v36 = vpop.f32.mrf.mxu1 }
 0x1a2   :  { %v879_v38 = vpop.f32.mrf.mxu2 }
 0x1a4   :  { %v996_v39 = vpop.f32.mrf.mxu3 }
 0x1a6   :  { %v930_v40 = vpop.f32.mrf.mxu0  ;;  %v943_v41 = vpop.f32.mrf.mxu1 }
 0x1a7   :  { %v960_v1 = vadd.f32 %v930_v40, %v894_v21  ;;  %v961_v3 = vadd.f32 %v943_v41, %v895_v32 }
 0x1a9   :  { %v1026_v4 = vadd.f32 %v996_v39, %v960_v1 }
 0x1aa   :  { %v956_v42 = vpop.f32.mrf.mxu2 }
 0x1ab   :  { %v962_v5 = vadd.f32 %v956_v42, %v896_v28 }
 0x1ac   :  { %v998_v43 = vpop.f32.mrf.mxu3 }
 0x1ae   :  { %v932_v9 = vpop.f32.mrf.mxu0  ;;  %v945_v34 = vpop.f32.mrf.mxu1 }
 0x1b2   :  { %v958_v44 = vpop.f32.mrf.mxu2 }
 0x1b4   :  { %v1075_v15 = vpop.f32.mrf.mxu3 }
 0x1b6   :  { %v1009_v35 = vpop.f32.mrf.mxu0  ;;  %v1022_v46 = vpop.f32.mrf.mxu1 }
 0x1b7   :  { %v1027_v6 = vadd.f32 %v1009_v35, %v961_v3  ;;  %v1028_v25 = vadd.f32 %v1022_v46, %v962_v5 }
 0x1b9   :  { %v1093_v14 = vadd.f32 %v1075_v15, %v1027_v6 }
 0x1ba   :  { %v1062_v13 = vpop.f32.mrf.mxu2 }
 0x1bb   :  { %v1092_v7 = vadd.f32 %v1062_v13, %v1026_v4 }
 0x1bc   :  { %v1077_v37 = vpop.f32.mrf.mxu3 }
 0x1be   :  { %v1011_v47 = vpop.f32.mrf.mxu0  ;;  %v1024_v30 = vpop.f32.mrf.mxu1 }
 0x1c2   :  { %v1064_v48 = vpop.f32.mrf.mxu2 }
 0x1c4   :  { %v1154_v49 = vpop.f32.mrf.mxu3 }
 0x1c6   :  { %v1088_v50 = vpop.f32.mrf.mxu0  ;;  %v1128_v52 = vpop.f32.mrf.mxu1 }
 0x1c7   :  { %v1094_v11 = vadd.f32 %v1088_v50, %v1028_v25  ;;  %v1158_v12 = vadd.f32 %v1128_v52, %v1092_v7 }
 0x1c9   :  { %v1160_v18 = vadd.f32 %v1154_v49, %v1094_v11 }
 0x1ca   :  { %v1141_v45 = vpop.f32.mrf.mxu2 }
 0x1cb   :  { %v1159_v19 = vadd.f32 %v1141_v45, %v1093_v14 }
 0x1cc   :  { %v1156_v56 = vpop.f32.mrf.mxu3 }
 0x1cd   :  { %v1318_v56 = vld [vmem:[%s1932_s2] sm:$0xff] }
 0x1ce   :  { %v1090_v57 = vpop.f32.mrf.mxu0  ;;  %v1130_v58 = vpop.f32.mrf.mxu1 }
 0x1d2   :  { %v1143_v60 = vpop.f32.mrf.mxu2 }
 0x1d4   :  { %v1260_v61 = vpop.f32.mrf.mxu3 }
 0x1d6   :  { %v1194_v62 = vpop.f32.mrf.mxu0  ;;  %v1207_v0 = vpop.f32.mrf.mxu1 }
 0x1d7   :  { %v1224_v16 = vadd.f32 %v1194_v62, %v1158_v12  ;;  %v1225_v20 = vadd.f32 %v1207_v0, %v1159_v19 }
 0x1d9   :  { %v1290_v22 = vadd.f32 %v1260_v61, %v1224_v16  ;;  %v1331_v61 = vld [vmem:[%s1933_s3] sm:$0xff] }
 0x1da   :  { %v1220_v2 = vpop.f32.mrf.mxu2 }
 0x1db   :  { %v1226_v24 = vadd.f32 %v1220_v2, %v1160_v18  ;;  %v1297_v31 = vmul.f32 %v1290_v22, %v1882_v51 }
 0x1dc   :  { %v1262_v23 = vpop.f32.mrf.mxu3 }
 0x1dd   :  { %v1305_v41 = vmul.f32 %v1297_v31, %v1297_v31 }
 0x1de   :  { %v1196_v8 = vpop.f32.mrf.mxu0  ;;  %v1209_v10 = vpop.f32.mrf.mxu1 }
 0x1e2   :  { %v1222_v17 = vpop.f32.mrf.mxu2 }
 0x1e6   :  { %v1273_v26 = vpop.f32.mrf.mxu0  ;;  %v1286_v27 = vpop.f32.mrf.mxu1 }
 0x1e7   :  { %v1291_v21 = vadd.f32 %v1273_v26, %v1225_v20  ;;  %v1292_v28 = vadd.f32 %v1286_v27, %v1226_v24 }
 0x1e9   :  { %v1298_v32 = vmul.f32 %v1291_v21, %v1884_v53  ;;  %v1299_v33 = vmul.f32 %v1292_v28, %v1894_v59 }
 0x1eb   :  { %v1300_v29 = vadd.f32 %v1298_v32, %v1297_v31  ;;  %v1306_v36 = vmul.f32 %v1298_v32, %v1298_v32  ;;  %v1307_v43 = vmul.f32 %v1299_v33, %v1299_v33 }
 0x1ed   :  { %v1301_v38 = vadd.f32 %v1300_v29, %v1299_v33  ;;  %v1308_v42 = vadd.f32 %v1306_v36, %v1305_v41 }
 0x1ee   :  { %v1275_v39 = vpop.f32.mrf.mxu0  ;;  %v1288_v40 = vpop.f32.mrf.mxu1 }
 0x1ef   :  { %1302 = vadd.xlane.f32.xlu2 %v1301_v38  ;;  %v1309_v9 = vadd.f32 %v1308_v42, %v1307_v43 }
 0x1f4   :  { %v684_v44 = vpop.xlane.xlu1 %683 }
 0x1f6   :  { %v692_v51 = vpop.xlane.xlu0 %691 }
 0x1f7   :  { %1310 = vadd.xlane.f32.xlu2 %v1309_v9 }
 0x262   :  { %v1303_v34 = vpop.xlane.xlu2 %1302 }
 0x263   :  { %v1304_v15 = vadd.f32 %v1303_v34, %v684_v44 }
 0x265   :  { %v1313_v35 = vmul.f32 0.001953125, %v1304_v15 }
 0x267   :  { %v1315_v13 = vmul.f32 %v1313_v35, %v1313_v35 }
 0x26a   :  { %v1311_v46 = vpop.xlane.xlu2 %1310 }
 0x26b   :  { %v1312_v53 = vadd.f32 %v1311_v46, %v692_v51 }
 0x26d   :  { %v1314_v59 = vmul.f32 0.001953125, %v1312_v53 }
 0x26f   :  { %v1316_v37 = vsub.f32 %v1314_v59, %v1315_v13 }
 0x271   :  { %v1317_v47 = vmax.f32 %v1316_v37, 0.0 }
 0x273   :  { %v1319_v30 = vadd.f32 1e-05, %v1317_v47 }
 0x275   :  { %1466 = vrsqrt.f32 %v1319_v30  ;;  %vm1326_vm5 = vweird.f32 %v1319_v30 }
 0x27b   :  { %v1467_v48 = vpop.eup %1466 }
 0x27c   :  { %v1321_v49 = vmul.f32 %v1467_v48, %v1319_v30  ;;  %vm1327_vm4 = vweird.f32 %v1467_v48 }
 0x27d   :  { %vm1328_vm6 = vmor %vm1326_vm5, %vm1327_vm4 }
 0x27e   :  { %v1322_v50 = vmul.f32 %v1467_v48, %v1321_v49 }
 0x280   :  { %v1323_v52 = vmul.f32 0.5, %v1322_v50 }
 0x282   :  { %v1324_v45 = vsub.f32 1.5, %v1323_v52 }
 0x284   :  { %v1325_v57 = vmul.f32 %v1467_v48, %v1324_v45 }
 0x286   :  { %v1329_v58 = vsel %vm1328_vm6, %v1467_v48, %v1325_v57 }
 0x287   :  { %v1330_v60 = vmul.f32 %v1329_v58, %v1318_v56 }
 0x289   :  { %1339 = vperm.xlu1 %1463, %v1330_v60   ;;  %v1332_v62 = vmul.f32 %v1330_v60, %v1313_v35 }
 0x28b   :  { %v1333_v0 = vsub.f32 %v1331_v61, %v1332_v62 }
 0x28d   :  { %1347 = vperm.xlu2 %1464, %v1333_v0  }
 0x2e7   :  { %v1348_v23 = vpop.permute.xlu2 %1347 }
 0x2fb   :  { %v1340_v1 = vpop.permute.xlu1 %1339 }
 0x2fc   :  { %v1342_v2 = vmul.f32 %v1340_v1, %v1886_v54  ;;  %v1343_v3 = vmul.f32 %v1340_v1, %v1888_v55  ;;  %v1344_v4 = vmul.f32 %v1340_v1, %v1896_v63  ;;  %v1362_v5 = vmul.f32 %v1340_v1, %v1290_v22 }
 0x2fd   :  { %v1363_v6 = vmul.f32 %v1340_v1, %v1291_v21  ;;  %v1364_v25 = vmul.f32 %v1340_v1, %v1292_v28 }
 0x2fe   :  { %v1350_v7 = vadd.f32 %v1348_v23, %v1342_v2  ;;  %v1351_v8 = vadd.f32 %v1348_v23, %v1343_v3  ;;  %v1352_v10 = vadd.f32 %v1348_v23, %v1344_v4  ;;  %v1365_v11 = vadd.f32 %v1362_v5, %v1348_v23 }
 0x2ff   :  { %v1366_v12 = vadd.f32 %v1363_v6, %v1348_v23  ;;  %v1367_v14 = vadd.f32 %v1364_v25, %v1348_v23 }
 0x300   :  { %v1353_v16 = vmax.f32 %v1350_v7, 0.0  ;;  %v1354_v17 = vmax.f32 %v1351_v8, 0.0  ;;  %v1355_v18 = vmax.f32 %v1352_v10, 0.0  ;;  %v1368_v19 = vmax.f32 %v1365_v11, 0.0 }
 0x301   :  { %v1369_v54 = vmax.f32 %v1366_v12, 0.0  ;;  %v1370_v55 = vmax.f32 %v1367_v14, 0.0 }
 0x302   :  { %1356 = vst [vmem:[%s1934_s4] sm:$0xff] %v1353_v16 }
 0x303   :  { %1357 = vst [vmem:[%s1934_s4 + $0x8] sm:$0xff] %v1354_v17 }
 0x304   :  { %1358 = vst [vmem:[%s1934_s4 + $0x10] sm:$0xff] %v1355_v18 }
 0x305   :  { %1450 = vst [vmem:[%s1934_s4 + $0x18] sm:$0xff] %v1368_v19 }
 0x306   :  { %1451 = vst [vmem:[%s1934_s4 + $0x20] sm:$0xff] %v1369_v54 }
 0x307   :  { %1452 = vst [vmem:[%s1934_s4 + $0x28] sm:$0xff] %v1370_v55 }

</bundles_post_ra>
